<compile_context>
chip_gen: v6e
topology: v6e:2x2x1
jax: 0.10.0
libtpu: 0.0.40
codegen_flags: <defaults>
</compile_context>

<pallas_src>
import jax
import jax.numpy as jnp
from jax.experimental import pallas as pl
from jax.experimental.pallas import tpu as pltpu


def _bisenet_output_kernel(x_ref, w1_ref, scale_ref, bias_ref, w2_ref, out_ref, acc_ref):
    # x_ref    : (1, 1, th+2, W+2, Cin) f32   zero-padded, haloed row tile (NHWC inside)
    # w1_ref   : (3, 3, Cin, Cmid)      f32   3x3 conv weight (HWIO)
    # scale_ref: (1, Cmid)              f32   folded BN scale (gamma / sqrt(var+eps))
    # bias_ref : (1, Cmid)              f32   folded BN bias  (beta - mean*scale)
    # w2_ref   : (Cmid, nC)             f32   1x1 conv weight
    # out_ref  : (1, nC, th*W)          f32   NCHW-flat output tile (lane dim = th*W)
    # acc_ref  : (th*W, Cmid)           f32   VMEM scratch accumulator
    th = x_ref.shape[2] - 2
    W = x_ref.shape[3] - 2
    Cin = x_ref.shape[4]

    x = x_ref[0, 0]                              # (th+2, W+2, Cin) f32
    acc_ref[...] = jnp.zeros_like(acc_ref)

    # 3x3 conv: 3 dx-shifted slabs (sublane realignment) computed once, reused for
    # the 3 dy row offsets (row slicing is cheap). One big-M matmul per tap.
    for dx in range(3):
        x_dx = x[:, dx:dx + W, :]                # (th+2, W, Cin)
        for dy in range(3):
            patch = x_dx[dy:dy + th].reshape(th * W, Cin)        # (M, Cin) f32
            acc_ref[...] += jax.lax.dot_general(
                patch, w1_ref[dy, dx],
                dimension_numbers=(((1,), (0,)), ((), ())),
                preferred_element_type=jnp.float32)              # (M, Cmid) f32

    # Fused inference BatchNorm + ReLU in f32.
    y = jnp.maximum(acc_ref[...] * scale_ref[...] + bias_ref[...], 0.0)   # (M, Cmid)

    # 1x1 conv == channel matmul (f32 operands, f32 accumulation).
    out = jax.lax.dot_general(
        y, w2_ref[...],
        dimension_numbers=(((1,), (0,)), ((), ())),
        preferred_element_type=jnp.float32)                      # (M, nC)

    # Single small XLU transpose -> lane-dense (nC, M) store (NCHW layout).
    out_ref[0] = out.T.astype(out_ref.dtype)


def _pick_tile_h(H, W):
    # Largest row tile that divides H and keeps the flattened tile (th*W) a
    # multiple of 128 lanes; fall back to the full image.
    for th in (256, 128, 64, 32, 16, 8):
        if th <= H and H % th == 0 and (th * W) % 128 == 0:
            return th
    return H


def bisenet_output(x_nchw, w1_hwio, bn_scale, bn_bias, w2, tile_h=None):
    """x_nchw: (N, Cin, H, W) float32 -> (N, nC, H, W) float32."""
    N, Cin, H, W = x_nchw.shape
    Cmid = w1_hwio.shape[3]
    nC = w2.shape[1]

    th = _pick_tile_h(H, W) if tile_h is None else tile_h
    assert H % th == 0, "tile_h must divide H"
    nT = H // th
    assert nT == 1 or (th * W) % 128 == 0, "tile_h*W must be a multiple of 128 when tiling"
    Wp = W + 2

    # TODO(synk): fuse the NCHW->NHWC transpose, zero-padding and halo gather into
    # the kernel via manual DMA (pl.ANY + pltpu.make_async_copy) to save HBM passes.
    x_nhwc = jnp.transpose(x_nchw, (0, 2, 3, 1)).astype(jnp.float32)    # NCHW -> NHWC
    x_pad = jnp.pad(x_nhwc, ((0, 0), (1, 1), (1, 1), (0, 0)))           # pad=1 for 3x3 conv
    row_idx = jnp.arange(nT)[:, None] * th + jnp.arange(th + 2)[None, :]
    x_tiles = x_pad[:, row_idx]                 # (N, nT, th+2, Wp, Cin), overlapping halos

    w1_f = w1_hwio.astype(jnp.float32)
    w2_f = w2.astype(jnp.float32)
    scale2d = bn_scale.reshape(1, Cmid).astype(jnp.float32)
    bias2d = bn_bias.reshape(1, Cmid).astype(jnp.float32)

    out_flat = pl.pallas_call(
        _bisenet_output_kernel,
        out_shape=jax.ShapeDtypeStruct((N, nC, H * W), jnp.float32),
        grid_spec=pltpu.PrefetchScalarGridSpec(
            num_scalar_prefetch=0,
            grid=(N, nT),
            in_specs=[
                pl.BlockSpec((1, 1, th + 2, Wp, Cin), lambda n, j: (n, j, 0, 0, 0)),
                pl.BlockSpec((3, 3, Cin, Cmid), lambda n, j: (0, 0, 0, 0)),
                pl.BlockSpec((1, Cmid), lambda n, j: (0, 0)),
                pl.BlockSpec((1, Cmid), lambda n, j: (0, 0)),
                pl.BlockSpec((Cmid, nC), lambda n, j: (0, 0)),
            ],
            out_specs=pl.BlockSpec((1, nC, th * W), lambda n, j: (n, 0, j)),
            scratch_shapes=[pltpu.VMEM((th * W, Cmid), jnp.float32)],
        ),
        compiler_params=pltpu.CompilerParams(
            dimension_semantics=("parallel", "parallel"),
            vmem_limit_bytes=32 * 1024 * 1024),
    )(x_tiles, w1_f, scale2d, bias2d, w2_f)

    return out_flat.reshape(N, nC, H, W)        # free row-major reshape (already NCHW)


def _reference(x_nchw, w1_hwio, bn_scale, bn_bias, w2):
    # Pure-JAX reference (NHWC conv) for correctness check.
    x = jnp.transpose(x_nchw, (0, 2, 3, 1))
    y = jax.lax.conv_general_dilated(
        x, w1_hwio, window_strides=(1, 1), padding="SAME",
        dimension_numbers=("NHWC", "HWIO", "NHWC"))
    y = jnp.maximum(y * bn_scale + bn_bias, 0.0)
    out = jnp.einsum("nhwc,co->nhwo", y, w2)
    return jnp.transpose(out, (0, 3, 1, 2))


if __name__ == "__main__":
    # Small shapes consistent with BiSeNetOutput(in_chan=4, mid_chan=8, n_classes=4)
    N, Cin, H, W = 2, 4, 16, 16
    Cmid, nC = 8, 4

    key = jax.random.PRNGKey(0)
    kx, k1, k2 = jax.random.split(key, 3)

    x = jax.random.normal(kx, (N, Cin, H, W), jnp.float32)

    # kaiming_normal_(a=1) -> gain = sqrt(2/(1+1^2)) = 1, std = 1/sqrt(fan_in)
    std1 = 1.0 / jnp.sqrt(jnp.float32(Cin * 3 * 3))
    w1_hwio = jax.random.normal(k1, (3, 3, Cin, Cmid), jnp.float32) * std1
    std2 = 1.0 / jnp.sqrt(jnp.float32(Cmid * 1 * 1))
    w2 = jax.random.normal(k2, (Cmid, nC), jnp.float32) * std2

    # BatchNorm2d default params (gamma=1, beta=0, running_mean=0, running_var=1),
    # folded into scale/bias applied in inference form.
    eps = 1e-5
    gamma = jnp.ones((Cmid,), jnp.float32)
    beta = jnp.zeros((Cmid,), jnp.float32)
    running_mean = jnp.zeros((Cmid,), jnp.float32)
    running_var = jnp.ones((Cmid,), jnp.float32)
    bn_scale = gamma / jnp.sqrt(running_var + eps)
    bn_bias = beta - running_mean * bn_scale

    out = bisenet_output(x, w1_hwio, bn_scale, bn_bias, w2, tile_h=8)
    out = jax.block_until_ready(out)

    ref = _reference(x, w1_hwio, bn_scale, bn_bias, w2)

    assert out.shape == (N, nC, H, W)
    # Loose-ish tolerance: TPU MXU may evaluate f32 matmuls with bf16 passes.
    assert jnp.allclose(out, ref, atol=2e-2, rtol=2e-2), float(jnp.max(jnp.abs(out - ref)))

    print("KERNEL_OK")
</pallas_src>

<mosaic_0001>
module attributes {stable_mosaic.version = 11 : i64} {
  func.func @_bisenet_output_kernel(%arg0: i32, %arg1: i32, %arg2: memref<1x1x10x18x4xf32, #tpu.memory_space<vmem>>, %arg3: memref<3x3x4x8xf32, #tpu.memory_space<vmem>>, %arg4: memref<1x8xf32, #tpu.memory_space<vmem>>, %arg5: memref<1x8xf32, #tpu.memory_space<vmem>>, %arg6: memref<8x4xf32, #tpu.memory_space<vmem>>, %arg7: memref<1x4x128xf32, #tpu.memory_space<vmem>>, %arg8: memref<128x8xf32, #tpu.memory_space<vmem>>) attributes {dimension_semantics = [#tpu.dimension_semantics<parallel>, #tpu.dimension_semantics<parallel>], iteration_bounds = array<i64: 2, 2>, scalar_prefetch = 0 : i64, scratch_operands = 1 : i64, tpu.core_type = #tpu.core_type<tc>, window_params = [{transform_indices = @transform_0, window_bounds = array<i64: 1, 1, 10, 18, 4>}, {pipeline_mode = #tpu.pipeline_mode<synchronous>, transform_indices = @transform_1, window_bounds = array<i64: 3, 3, 4, 8>}, {pipeline_mode = #tpu.pipeline_mode<synchronous>, transform_indices = @transform_2, window_bounds = array<i64: 1, 8>}, {pipeline_mode = #tpu.pipeline_mode<synchronous>, transform_indices = @transform_3, window_bounds = array<i64: 1, 8>}, {pipeline_mode = #tpu.pipeline_mode<synchronous>, transform_indices = @transform_4, window_bounds = array<i64: 8, 4>}, {transform_indices = @transform_5, window_bounds = array<i64: 1, 4, 128>}]} {
    %c0 = arith.constant 0 : index
    %c0_0 = arith.constant 0 : index
    %c0_1 = arith.constant 0 : index
    %c0_2 = arith.constant 0 : index
    %c0_3 = arith.constant 0 : index
    %0 = vector.load %arg2[%c0, %c0_0, %c0_1, %c0_2, %c0_3] : memref<1x1x10x18x4xf32, #tpu.memory_space<vmem>>, vector<1x1x10x18x4xf32>
    %1 = vector.shape_cast %0 : vector<1x1x10x18x4xf32> to vector<10x18x4xf32>
    %cst = arith.constant 0.000000e+00 : f32
    %2 = vector.broadcast %cst : f32 to vector<128x8xf32>
    %c0_4 = arith.constant 0 : index
    %c0_5 = arith.constant 0 : index
    %3 = vector.load %arg8[%c0_4, %c0_5] : memref<128x8xf32, #tpu.memory_space<vmem>>, vector<128x8xf32>
    tpu.vector_store %arg8[%c0_4, %c0_5], %2 {strides = array<i32>} : memref<128x8xf32, #tpu.memory_space<vmem>>, vector<128x8xf32>,
    %4 = vector.extract_strided_slice %1 {offsets = [0, 0, 0], sizes = [10, 16, 4], strides = [1, 1, 1]} : vector<10x18x4xf32> to vector<10x16x4xf32>
    %5 = vector.extract_strided_slice %4 {offsets = [0, 0, 0], sizes = [8, 16, 4], strides = [1, 1, 1]} : vector<10x16x4xf32> to vector<8x16x4xf32>
    %6 = vector.shape_cast %5 : vector<8x16x4xf32> to vector<128x4xf32>
    %c0_6 = arith.constant 0 : index
    %c0_7 = arith.constant 0 : index
    %7 = vector.load %arg8[%c0_6, %c0_7] : memref<128x8xf32, #tpu.memory_space<vmem>>, vector<128x8xf32>
    %c0_8 = arith.constant 0 : index
    %c0_9 = arith.constant 0 : index
    %c0_10 = arith.constant 0 : index
    %c0_11 = arith.constant 0 : index
    %8 = vector.load %arg3[%c0_8, %c0_9, %c0_10, %c0_11] : memref<3x3x4x8xf32, #tpu.memory_space<vmem>>, vector<1x1x4x8xf32>
    %9 = vector.shape_cast %8 : vector<1x1x4x8xf32> to vector<4x8xf32>
    %cst_12 = arith.constant dense<0.000000e+00> : vector<128x8xf32>
    %10 = tpu.matmul %6, %9, %cst_12 {dimension_numbers = #tpu.dot_dimension_numbers<[1], [0], [0], [1], [0, 0, 1, 1], [], []>} : vector<128x4xf32>, vector<4x8xf32>, vector<128x8xf32> -> vector<128x8xf32>
    %11 = arith.addf %7, %10 : vector<128x8xf32>
    %c0_13 = arith.constant 0 : index
    %c0_14 = arith.constant 0 : index
    %12 = vector.load %arg8[%c0_13, %c0_14] : memref<128x8xf32, #tpu.memory_space<vmem>>, vector<128x8xf32>
    tpu.vector_store %arg8[%c0_13, %c0_14], %11 {strides = array<i32>} : memref<128x8xf32, #tpu.memory_space<vmem>>, vector<128x8xf32>,
    %13 = vector.extract_strided_slice %4 {offsets = [1, 0, 0], sizes = [8, 16, 4], strides = [1, 1, 1]} : vector<10x16x4xf32> to vector<8x16x4xf32>
    %14 = vector.shape_cast %13 : vector<8x16x4xf32> to vector<128x4xf32>
    %c0_15 = arith.constant 0 : index
    %c0_16 = arith.constant 0 : index
    %15 = vector.load %arg8[%c0_15, %c0_16] : memref<128x8xf32, #tpu.memory_space<vmem>>, vector<128x8xf32>
    %c1 = arith.constant 1 : index
    %c0_17 = arith.constant 0 : index
    %c0_18 = arith.constant 0 : index
    %c0_19 = arith.constant 0 : index
    %16 = vector.load %arg3[%c1, %c0_17, %c0_18, %c0_19] : memref<3x3x4x8xf32, #tpu.memory_space<vmem>>, vector<1x1x4x8xf32>
    %17 = vector.shape_cast %16 : vector<1x1x4x8xf32> to vector<4x8xf32>
    %cst_20 = arith.constant dense<0.000000e+00> : vector<128x8xf32>
    %18 = tpu.matmul %14, %17, %cst_20 {dimension_numbers = #tpu.dot_dimension_numbers<[1], [0], [0], [1], [0, 0, 1, 1], [], []>} : vector<128x4xf32>, vector<4x8xf32>, vector<128x8xf32> -> vector<128x8xf32>
    %19 = arith.addf %15, %18 : vector<128x8xf32>
    %c0_21 = arith.constant 0 : index
    %c0_22 = arith.constant 0 : index
    %20 = vector.load %arg8[%c0_21, %c0_22] : memref<128x8xf32, #tpu.memory_space<vmem>>, vector<128x8xf32>
    tpu.vector_store %arg8[%c0_21, %c0_22], %19 {strides = array<i32>} : memref<128x8xf32, #tpu.memory_space<vmem>>, vector<128x8xf32>,
    %21 = vector.extract_strided_slice %4 {offsets = [2, 0, 0], sizes = [8, 16, 4], strides = [1, 1, 1]} : vector<10x16x4xf32> to vector<8x16x4xf32>
    %22 = vector.shape_cast %21 : vector<8x16x4xf32> to vector<128x4xf32>
    %c0_23 = arith.constant 0 : index
    %c0_24 = arith.constant 0 : index
    %23 = vector.load %arg8[%c0_23, %c0_24] : memref<128x8xf32, #tpu.memory_space<vmem>>, vector<128x8xf32>
    %c2 = arith.constant 2 : index
    %c0_25 = arith.constant 0 : index
    %c0_26 = arith.constant 0 : index
    %c0_27 = arith.constant 0 : index
    %24 = vector.load %arg3[%c2, %c0_25, %c0_26, %c0_27] : memref<3x3x4x8xf32, #tpu.memory_space<vmem>>, vector<1x1x4x8xf32>
    %25 = vector.shape_cast %24 : vector<1x1x4x8xf32> to vector<4x8xf32>
    %cst_28 = arith.constant dense<0.000000e+00> : vector<128x8xf32>
    %26 = tpu.matmul %22, %25, %cst_28 {dimension_numbers = #tpu.dot_dimension_numbers<[1], [0], [0], [1], [0, 0, 1, 1], [], []>} : vector<128x4xf32>, vector<4x8xf32>, vector<128x8xf32> -> vector<128x8xf32>
    %27 = arith.addf %23, %26 : vector<128x8xf32>
    %c0_29 = arith.constant 0 : index
    %c0_30 = arith.constant 0 : index
    %28 = vector.load %arg8[%c0_29, %c0_30] : memref<128x8xf32, #tpu.memory_space<vmem>>, vector<128x8xf32>
    tpu.vector_store %arg8[%c0_29, %c0_30], %27 {strides = array<i32>} : memref<128x8xf32, #tpu.memory_space<vmem>>, vector<128x8xf32>,
    %29 = vector.extract_strided_slice %1 {offsets = [0, 1, 0], sizes = [10, 16, 4], strides = [1, 1, 1]} : vector<10x18x4xf32> to vector<10x16x4xf32>
    %30 = vector.extract_strided_slice %29 {offsets = [0, 0, 0], sizes = [8, 16, 4], strides = [1, 1, 1]} : vector<10x16x4xf32> to vector<8x16x4xf32>
    %31 = vector.shape_cast %30 : vector<8x16x4xf32> to vector<128x4xf32>
    %c0_31 = arith.constant 0 : index
    %c0_32 = arith.constant 0 : index
    %32 = vector.load %arg8[%c0_31, %c0_32] : memref<128x8xf32, #tpu.memory_space<vmem>>, vector<128x8xf32>
    %c0_33 = arith.constant 0 : index
    %c1_34 = arith.constant 1 : index
    %c0_35 = arith.constant 0 : index
    %c0_36 = arith.constant 0 : index
    %33 = vector.load %arg3[%c0_33, %c1_34, %c0_35, %c0_36] : memref<3x3x4x8xf32, #tpu.memory_space<vmem>>, vector<1x1x4x8xf32>
    %34 = vector.shape_cast %33 : vector<1x1x4x8xf32> to vector<4x8xf32>
    %cst_37 = arith.constant dense<0.000000e+00> : vector<128x8xf32>
    %35 = tpu.matmul %31, %34, %cst_37 {dimension_numbers = #tpu.dot_dimension_numbers<[1], [0], [0], [1], [0, 0, 1, 1], [], []>} : vector<128x4xf32>, vector<4x8xf32>, vector<128x8xf32> -> vector<128x8xf32>
    %36 = arith.addf %32, %35 : vector<128x8xf32>
    %c0_38 = arith.constant 0 : index
    %c0_39 = arith.constant 0 : index
    %37 = vector.load %arg8[%c0_38, %c0_39] : memref<128x8xf32, #tpu.memory_space<vmem>>, vector<128x8xf32>
    tpu.vector_store %arg8[%c0_38, %c0_39], %36 {strides = array<i32>} : memref<128x8xf32, #tpu.memory_space<vmem>>, vector<128x8xf32>,
    %38 = vector.extract_strided_slice %29 {offsets = [1, 0, 0], sizes = [8, 16, 4], strides = [1, 1, 1]} : vector<10x16x4xf32> to vector<8x16x4xf32>
    %39 = vector.shape_cast %38 : vector<8x16x4xf32> to vector<128x4xf32>
    %c0_40 = arith.constant 0 : index
    %c0_41 = arith.constant 0 : index
    %40 = vector.load %arg8[%c0_40, %c0_41] : memref<128x8xf32, #tpu.memory_space<vmem>>, vector<128x8xf32>
    %c1_42 = arith.constant 1 : index
    %c1_43 = arith.constant 1 : index
    %c0_44 = arith.constant 0 : index
    %c0_45 = arith.constant 0 : index
    %41 = vector.load %arg3[%c1_42, %c1_43, %c0_44, %c0_45] : memref<3x3x4x8xf32, #tpu.memory_space<vmem>>, vector<1x1x4x8xf32>
    %42 = vector.shape_cast %41 : vector<1x1x4x8xf32> to vector<4x8xf32>
    %cst_46 = arith.constant dense<0.000000e+00> : vector<128x8xf32>
    %43 = tpu.matmul %39, %42, %cst_46 {dimension_numbers = #tpu.dot_dimension_numbers<[1], [0], [0], [1], [0, 0, 1, 1], [], []>} : vector<128x4xf32>, vector<4x8xf32>, vector<128x8xf32> -> vector<128x8xf32>
    %44 = arith.addf %40, %43 : vector<128x8xf32>
    %c0_47 = arith.constant 0 : index
    %c0_48 = arith.constant 0 : index
    %45 = vector.load %arg8[%c0_47, %c0_48] : memref<128x8xf32, #tpu.memory_space<vmem>>, vector<128x8xf32>
    tpu.vector_store %arg8[%c0_47, %c0_48], %44 {strides = array<i32>} : memref<128x8xf32, #tpu.memory_space<vmem>>, vector<128x8xf32>,
    %46 = vector.extract_strided_slice %29 {offsets = [2, 0, 0], sizes = [8, 16, 4], strides = [1, 1, 1]} : vector<10x16x4xf32> to vector<8x16x4xf32>
    %47 = vector.shape_cast %46 : vector<8x16x4xf32> to vector<128x4xf32>
    %c0_49 = arith.constant 0 : index
    %c0_50 = arith.constant 0 : index
    %48 = vector.load %arg8[%c0_49, %c0_50] : memref<128x8xf32, #tpu.memory_space<vmem>>, vector<128x8xf32>
    %c2_51 = arith.constant 2 : index
    %c1_52 = arith.constant 1 : index
    %c0_53 = arith.constant 0 : index
    %c0_54 = arith.constant 0 : index
    %49 = vector.load %arg3[%c2_51, %c1_52, %c0_53, %c0_54] : memref<3x3x4x8xf32, #tpu.memory_space<vmem>>, vector<1x1x4x8xf32>
    %50 = vector.shape_cast %49 : vector<1x1x4x8xf32> to vector<4x8xf32>
    %cst_55 = arith.constant dense<0.000000e+00> : vector<128x8xf32>
    %51 = tpu.matmul %47, %50, %cst_55 {dimension_numbers = #tpu.dot_dimension_numbers<[1], [0], [0], [1], [0, 0, 1, 1], [], []>} : vector<128x4xf32>, vector<4x8xf32>, vector<128x8xf32> -> vector<128x8xf32>
    %52 = arith.addf %48, %51 : vector<128x8xf32>
    %c0_56 = arith.constant 0 : index
    %c0_57 = arith.constant 0 : index
    %53 = vector.load %arg8[%c0_56, %c0_57] : memref<128x8xf32, #tpu.memory_space<vmem>>, vector<128x8xf32>
    tpu.vector_store %arg8[%c0_56, %c0_57], %52 {strides = array<i32>} : memref<128x8xf32, #tpu.memory_space<vmem>>, vector<128x8xf32>,
    %54 = vector.extract_strided_slice %1 {offsets = [0, 2, 0], sizes = [10, 16, 4], strides = [1, 1, 1]} : vector<10x18x4xf32> to vector<10x16x4xf32>
    %55 = vector.extract_strided_slice %54 {offsets = [0, 0, 0], sizes = [8, 16, 4], strides = [1, 1, 1]} : vector<10x16x4xf32> to vector<8x16x4xf32>
    %56 = vector.shape_cast %55 : vector<8x16x4xf32> to vector<128x4xf32>
    %c0_58 = arith.constant 0 : index
    %c0_59 = arith.constant 0 : index
    %57 = vector.load %arg8[%c0_58, %c0_59] : memref<128x8xf32, #tpu.memory_space<vmem>>, vector<128x8xf32>
    %c0_60 = arith.constant 0 : index
    %c2_61 = arith.constant 2 : index
    %c0_62 = arith.constant 0 : index
    %c0_63 = arith.constant 0 : index
    %58 = vector.load %arg3[%c0_60, %c2_61, %c0_62, %c0_63] : memref<3x3x4x8xf32, #tpu.memory_space<vmem>>, vector<1x1x4x8xf32>
    %59 = vector.shape_cast %58 : vector<1x1x4x8xf32> to vector<4x8xf32>
    %cst_64 = arith.constant dense<0.000000e+00> : vector<128x8xf32>
    %60 = tpu.matmul %56, %59, %cst_64 {dimension_numbers = #tpu.dot_dimension_numbers<[1], [0], [0], [1], [0, 0, 1, 1], [], []>} : vector<128x4xf32>, vector<4x8xf32>, vector<128x8xf32> -> vector<128x8xf32>
    %61 = arith.addf %57, %60 : vector<128x8xf32>
    %c0_65 = arith.constant 0 : index
    %c0_66 = arith.constant 0 : index
    %62 = vector.load %arg8[%c0_65, %c0_66] : memref<128x8xf32, #tpu.memory_space<vmem>>, vector<128x8xf32>
    tpu.vector_store %arg8[%c0_65, %c0_66], %61 {strides = array<i32>} : memref<128x8xf32, #tpu.memory_space<vmem>>, vector<128x8xf32>,
    %63 = vector.extract_strided_slice %54 {offsets = [1, 0, 0], sizes = [8, 16, 4], strides = [1, 1, 1]} : vector<10x16x4xf32> to vector<8x16x4xf32>
    %64 = vector.shape_cast %63 : vector<8x16x4xf32> to vector<128x4xf32>
    %c0_67 = arith.constant 0 : index
    %c0_68 = arith.constant 0 : index
    %65 = vector.load %arg8[%c0_67, %c0_68] : memref<128x8xf32, #tpu.memory_space<vmem>>, vector<128x8xf32>
    %c1_69 = arith.constant 1 : index
    %c2_70 = arith.constant 2 : index
    %c0_71 = arith.constant 0 : index
    %c0_72 = arith.constant 0 : index
    %66 = vector.load %arg3[%c1_69, %c2_70, %c0_71, %c0_72] : memref<3x3x4x8xf32, #tpu.memory_space<vmem>>, vector<1x1x4x8xf32>
    %67 = vector.shape_cast %66 : vector<1x1x4x8xf32> to vector<4x8xf32>
    %cst_73 = arith.constant dense<0.000000e+00> : vector<128x8xf32>
    %68 = tpu.matmul %64, %67, %cst_73 {dimension_numbers = #tpu.dot_dimension_numbers<[1], [0], [0], [1], [0, 0, 1, 1], [], []>} : vector<128x4xf32>, vector<4x8xf32>, vector<128x8xf32> -> vector<128x8xf32>
    %69 = arith.addf %65, %68 : vector<128x8xf32>
    %c0_74 = arith.constant 0 : index
    %c0_75 = arith.constant 0 : index
    %70 = vector.load %arg8[%c0_74, %c0_75] : memref<128x8xf32, #tpu.memory_space<vmem>>, vector<128x8xf32>
    tpu.vector_store %arg8[%c0_74, %c0_75], %69 {strides = array<i32>} : memref<128x8xf32, #tpu.memory_space<vmem>>, vector<128x8xf32>,
    %71 = vector.extract_strided_slice %54 {offsets = [2, 0, 0], sizes = [8, 16, 4], strides = [1, 1, 1]} : vector<10x16x4xf32> to vector<8x16x4xf32>
    %72 = vector.shape_cast %71 : vector<8x16x4xf32> to vector<128x4xf32>
    %c0_76 = arith.constant 0 : index
    %c0_77 = arith.constant 0 : index
    %73 = vector.load %arg8[%c0_76, %c0_77] : memref<128x8xf32, #tpu.memory_space<vmem>>, vector<128x8xf32>
    %c2_78 = arith.constant 2 : index
    %c2_79 = arith.constant 2 : index
    %c0_80 = arith.constant 0 : index
    %c0_81 = arith.constant 0 : index
    %74 = vector.load %arg3[%c2_78, %c2_79, %c0_80, %c0_81] : memref<3x3x4x8xf32, #tpu.memory_space<vmem>>, vector<1x1x4x8xf32>
    %75 = vector.shape_cast %74 : vector<1x1x4x8xf32> to vector<4x8xf32>
    %cst_82 = arith.constant dense<0.000000e+00> : vector<128x8xf32>
    %76 = tpu.matmul %72, %75, %cst_82 {dimension_numbers = #tpu.dot_dimension_numbers<[1], [0], [0], [1], [0, 0, 1, 1], [], []>} : vector<128x4xf32>, vector<4x8xf32>, vector<128x8xf32> -> vector<128x8xf32>
    %77 = arith.addf %73, %76 : vector<128x8xf32>
    %c0_83 = arith.constant 0 : index
    %c0_84 = arith.constant 0 : index
    %78 = vector.load %arg8[%c0_83, %c0_84] : memref<128x8xf32, #tpu.memory_space<vmem>>, vector<128x8xf32>
    tpu.vector_store %arg8[%c0_83, %c0_84], %77 {strides = array<i32>} : memref<128x8xf32, #tpu.memory_space<vmem>>, vector<128x8xf32>,
    %c0_85 = arith.constant 0 : index
    %c0_86 = arith.constant 0 : index
    %79 = vector.load %arg8[%c0_85, %c0_86] : memref<128x8xf32, #tpu.memory_space<vmem>>, vector<128x8xf32>
    %c0_87 = arith.constant 0 : index
    %c0_88 = arith.constant 0 : index
    %80 = vector.load %arg4[%c0_87, %c0_88] : memref<1x8xf32, #tpu.memory_space<vmem>>, vector<1x8xf32>
    %81 = vector.broadcast %80 : vector<1x8xf32> to vector<128x8xf32>
    %82 = arith.mulf %79, %81 : vector<128x8xf32>
    %c0_89 = arith.constant 0 : index
    %c0_90 = arith.constant 0 : index
    %83 = vector.load %arg5[%c0_89, %c0_90] : memref<1x8xf32, #tpu.memory_space<vmem>>, vector<1x8xf32>
    %84 = vector.broadcast %83 : vector<1x8xf32> to vector<128x8xf32>
    %85 = arith.addf %82, %84 : vector<128x8xf32>
    %cst_91 = arith.constant 0.000000e+00 : f32
    %86 = vector.broadcast %cst_91 : f32 to vector<128x8xf32>
    %87 = arith.maximumf %85, %86 : vector<128x8xf32>
    %c0_92 = arith.constant 0 : index
    %c0_93 = arith.constant 0 : index
    %88 = vector.load %arg6[%c0_92, %c0_93] : memref<8x4xf32, #tpu.memory_space<vmem>>, vector<8x4xf32>
    %cst_94 = arith.constant dense<0.000000e+00> : vector<128x4xf32>
    %89 = tpu.matmul %87, %88, %cst_94 {dimension_numbers = #tpu.dot_dimension_numbers<[1], [0], [0], [1], [0, 0, 1, 1], [], []>} : vector<128x8xf32>, vector<8x4xf32>, vector<128x4xf32> -> vector<128x4xf32>
    %90 = tpu.transpose %89, [1, 0] : vector<128x4xf32> -> vector<4x128xf32>
    %c0_95 = arith.constant 0 : index
    %c0_96 = arith.constant 0 : index
    %c0_97 = arith.constant 0 : index
    %91 = vector.load %arg7[%c0_95, %c0_96, %c0_97] : memref<1x4x128xf32, #tpu.memory_space<vmem>>, vector<1x4x128xf32>
    %92 = vector.shape_cast %91 : vector<1x4x128xf32> to vector<4x128xf32>
    %93 = vector.shape_cast %90 : vector<4x128xf32> to vector<1x4x128xf32>
    tpu.vector_store %arg7[%c0_95, %c0_96, %c0_97], %93 {strides = array<i32>} : memref<1x4x128xf32, #tpu.memory_space<vmem>>, vector<1x4x128xf32>,
    return
  }
  func.func @transform_0(%arg0: i32, %arg1: i32) -> (i32, i32, i32, i32, i32) {
    %c0_i32 = arith.constant 0 : i32
    %c0_i32_0 = arith.constant 0 : i32
    %c0_i32_1 = arith.constant 0 : i32
    %c0_i32_2 = arith.constant 0 : i32
    return %arg0, %arg1, %c0_i32, %c0_i32_0, %c0_i32_1 : i32, i32, i32, i32, i32
  }
  func.func @transform_1(%arg0: i32, %arg1: i32) -> (i32, i32, i32, i32) {
    %c0_i32 = arith.constant 0 : i32
    %c0_i32_0 = arith.constant 0 : i32
    %c0_i32_1 = arith.constant 0 : i32
    %c0_i32_2 = arith.constant 0 : i32
    %c0_i32_3 = arith.constant 0 : i32
    return %c0_i32, %c0_i32_0, %c0_i32_1, %c0_i32_2 : i32, i32, i32, i32
  }
  func.func @transform_2(%arg0: i32, %arg1: i32) -> (i32, i32) {
    %c0_i32 = arith.constant 0 : i32
    %c0_i32_0 = arith.constant 0 : i32
    %c0_i32_1 = arith.constant 0 : i32
    return %c0_i32, %c0_i32_0 : i32, i32
  }
  func.func @transform_3(%arg0: i32, %arg1: i32) -> (i32, i32) {
    %c0_i32 = arith.constant 0 : i32
    %c0_i32_0 = arith.constant 0 : i32
    %c0_i32_1 = arith.constant 0 : i32
    return %c0_i32, %c0_i32_0 : i32, i32
  }
  func.func @transform_4(%arg0: i32, %arg1: i32) -> (i32, i32) {
    %c0_i32 = arith.constant 0 : i32
    %c0_i32_0 = arith.constant 0 : i32
    %c0_i32_1 = arith.constant 0 : i32
    return %c0_i32, %c0_i32_0 : i32, i32
  }
  func.func @transform_5(%arg0: i32, %arg1: i32) -> (i32, i32, i32) {
    %c0_i32 = arith.constant 0 : i32
    %c0_i32_0 = arith.constant 0 : i32
    return %arg0, %c0_i32, %arg1 : i32, i32, i32
  }
}

</mosaic_0001>

<bundles_post_ra>
// kernel: tpu_custom_call.1
= control target key start
LH: loop header
LB: loop body
LE: loop exit
PB: predicated region body
PF: predicated region fallthrough
CT: control target
= control target key end

     0   :  { %10 = vsyncpa [#allocation4], 0  ;;  %s4447_s0 = inlined_call_operand.vmem [shape: f32[2,2,10,18,4], index: 0, kind: input, shape index: {}]   ;;  %s4448_s1 = inlined_call_operand.vmem [shape: f32[3,3,4,8], index: 1, kind: input, shape index: {}]   ;;  %s4449_s2 = inlined_call_operand.vmem [shape: f32[1,8], index: 2, kind: input, shape index: {}]   ;;  %s4450_s3 = inlined_call_operand.vmem [shape: f32[1,8], index: 3, kind: input, shape index: {}]   ;;  %s4451_s4 = inlined_call_operand.vmem [shape: f32[8,4], index: 4, kind: input, shape index: {}]   ;;  %s4452_s5 = inlined_call_operand.hbm [shape: f32[2,4,256], index: 5, kind: output, shape index: {}]  }
   0x1   :  { %12 = vsyncpa [#allocation4 + $0x1], 0  ;;  %s3556_s18 = smov 0   ;;  %s3558_s19 = smov 0  }
   0x2   :  { %s3560_s20 = smov 0   ;;  %s3562_s21 = smov 0  }
   0x3   :  { %s3564_s22 = smov 0   ;;  %s3566_s23 = smov 0  }
   0x4   :  { %s3568_s24 = smov 0   ;;  %s3570_s25 = smov 0  }
   0x5 LB: > { %s2735_s26 = sadd.s32 4294967295, %s3522_s25   ;;  %s2736_s27 = sadd.s32 4294967294, %s3522_s25   ;;  %s3522_s25 = sphi %s3570_s25, %s18_s25   ;;  %s3518_s24 = sphi %s3568_s24, %s4461_s24   ;;  %s3514_s23 = sphi %s3566_s23, %s4460_s23   ;;  %s3510_s22 = sphi %s3564_s22, %s4459_s22   ;;  %s3506_s21 = sphi %s3562_s21, %s4458_s21   ;;  %s3502_s20 = sphi %s3560_s20, %s4457_s20   ;;  %s3498_s19 = sphi %s3558_s19, %s4456_s19   ;;  %s3494_s18 = sphi %s3556_s18, %s4455_s18  }
   0x6   : > { %s27_s28 = sadd.s32 1, %s3514_s23  ;;  %s30_s29 = sadd.s32 1, %s3518_s24 }
   0x7   : > { %p28_p0 = scmp.ge.s32.totalorder %s27_s28, 2  ;;  %p161_p1 = scmp.ne.s32.totalorder %s3502_s20, %s3498_s19 }
   0x8   : > { %p162_p2 = scmp.eq.s32.totalorder %s2735_s26, 3  ;;  %p167_p5 = scmp.ne.s32.totalorder %s3498_s19, %s3494_s18 }
   0x9   : > { %s4463_s28 = smov (%p28_p0, %s27_s28), 0  ;;  %s4465_s29 = smov (!%p28_p0, %s30_s29), %s3518_s24 }
   0xa   : > { %s147_s30 = ssub.s32 %s3514_s23, %s4463_s28  ;;  %p3607_p3 = por %p162_p2, %p161_p1 }
   0xb   : > { %p32_p4 = scmp.ge.s32.totalorder %s4465_s29, 2  ;;  %p168_p6 = scmp.eq.s32.totalorder %s2736_s27, 3 }
   0xc   : > { %p2739_p7 = scmp.ge.s32.totalorder %s3522_s25, 1  ;;  %p210_p9 = scmp.lt.s32.totalorder %s3522_s25, 5 }
   0xd   : > { %s4467_s29 = smov (%p32_p4, %s4465_s29), 0  ;;  %p3616_p8 = por %p168_p6, %p167_p5 }
   0xe   : > { %s146_s8 = ssub.s32 %s3518_s24, %s4467_s29  ;;  %s151_s9 = sadd.s32 1, %s3502_s20 }
   0xf   : > { %s148_s10 = sor.u32 %s147_s30, %s146_s8  ;;  %p211_p10 = pnand %p2739_p7, %p210_p9 }
  0x10   : > { %p149_p11 = scmp.eq.s32.totalorder %s148_s10, 0  ;;  %p242_p12 = scmp.lt.s32.totalorder (!%p211_p10), %s3510_s22, 1 }
  0x11   : > { %214 = sbr.rel (%p211_p10) target bundleno = 705 (0x2c1), region = 40  ;;  %p244_p13 = scmp.lt.s32.totalorder (!%p211_p10), %s3506_s21, 1 }
  0x12   : > { %s3625_s11 = scalar_select %p149_p11, %s3502_s20, %s151_s9  }
  0x16   : > { %v314_v0 = vld [vmem:[%s4448_s1] sm:$0xf]  ;;  %vm364_vm0 = vcmask 1043456   ;;  %v2777_v1 = vld [vmem:[%s4448_s1 + $0x18] sm:$0xf]  ;;  %s243_s30 = scalar_select %p242_p12, %s3510_s22, 1 }
  0x17   : > { %3096 = vmatprep.subr.msk.mxu0 %vm364_vm0, %v314_v0  ;;  %v2759_v2 = vld [vmem:[%s4448_s1 + $0xc] sm:$0xf]  ;;  %v2795_v3 = vld [vmem:[%s4448_s1 + $0x4] sm:$0xf]  ;;  %s245_s8 = scalar_select %p244_p13, %s3506_s21, 1  ;;  %vm315_vm1 = vcmask 31744  }
  0x18   : > { %3097 = vmatpush3.msk.msra.mxu0 %vm364_vm0, %v314_v0  ;;  %3122 = vmatprep.subr.msk.mxu1 %vm364_vm0, %v2759_v2  ;;  %s3357_s9 = smul.u32 60, %s243_s30  ;;  %v3677_v8 = vld [vmem:[%s4448_s1 + $0x10] sm:$0xf]  ;;  %v3682_v9 = vld [vmem:[%s4448_s1 + $0x1c] sm:$0xf]  ;;  %vm1648_vm2 = vcmask 1045504  }
  0x19   : > { %3148 = vmatprep.subr.msk.mxu0 %vm364_vm0, %v2777_v1  ;;  %3123 = vmatpush3.msk.msra.mxu1 %vm364_vm0, %v2759_v2  ;;  %s3356_s10 = smul.u32 30, %s245_s8  ;;  %vm961_vm3 = vcmask 1046528   ;;  %vm281_vm4 = vcmask 64512   ;;  %s239_s8 = sand.u32 1, %s3498_s19  }
  0x1a   : > { %3174 = vmatprep.subr.msk.mxu1 %vm364_vm0, %v2795_v3  ;;  %s2639_s27 = scalar_lea.sflag [#allocation4], %s239_s8 }
  0x1b   : > { %s248_s12 = sadd.s32 %s3357_s9, %s3356_s10  ;;  %s2740_s9 = sshll.u32 %s239_s8, 2 }
  0x1c   : > { %s2741_s13 = sshll.u32 %s248_s12, 3  ;;  %s2922_s10 = sshll.u32 %s3510_s22, 1 }
  0x1d   : > { %s3652_s16 = scalar_lea.vmem %s4447_s0, %s2741_s13  ;;  %s2650_s12 = sadd.s32 %s3506_s21, %s2922_s10 }
  0x1e   : > { %v3655_v4 = vld [vmem:[%s3652_s16] sm:$0xff]  ;;  %v3658_v5 = vld [vmem:[%s3652_s16 + $0x8] sm:$0xff]  ;;  %v3661_v6 = vld [vmem:[%s3652_s16 + $0x18] sm:$0xff]  ;;  %s241_s13 = scalar_lea.vmem [#allocation3], %s2740_s9  ;;  %s2923_s15 = sshll.u32 %s2650_s12, 6 }
  0x1f   : > { %3098 = vmatprep.mubr.msk.f32.mxu0 %vm315_vm1, %v3655_v4  ;;  %v3666_v7 = vld [vmem:[%s3652_s16 + $0x20] sm:$0xff]  ;;  %3124 = vmatprep.mubr.msk.f32.mxu1 %vm315_vm1, %v3661_v6  ;;  %v3688_v10 = vld [vmem:[%s3652_s16 + $0x30] sm:$0xff]  ;;  %v1649_v11 = vrot.slane %v3655_v4, 2  ;;  %v1650_v12 = vrot.slane %v3658_v5, 2  ;;  %v3696_v13 = vld [vmem:[%s3652_s16 + $0x38] sm:$0xff]  ;;  %v1654_v17 = vrot.slane %v3661_v6, 2  ;;  %s2652_s26 = scalar_lea.hbm %s4452_s5, %s2923_s15 }
  0x20   : > { %3099 = vmatmul.mubr.msk.f32.vlgmr.msra.gmra.mxu0 %vm315_vm1, %v3658_v5  ;;  %3125 = vmatmul.mubr.msk.f32.vlgmr.msra.gmra.mxu1 %vm315_vm1, %v3666_v7  ;;  %v3705_v14 = vld [vmem:[%s3652_s16 + $0x48] sm:$0xff]  ;;  %v3714_v15 = vld [vmem:[%s3652_s16 + $0x50] sm:$0xff]  ;;  %v1655_v18 = vrot.slane %v3666_v7, 2  ;;  %v3724_v19 = vld [vmem:[%s3652_s16 + $0x60] sm:$0xff]  ;;  %v1659_v26 = vrot.slane %v3688_v10, 2  ;;  %v1660_v28 = vrot.slane %v3696_v13, 2 }
  0x21   : > { %3149 = vmatpush3.msk.msra.mxu0 %vm364_vm0, %v2777_v1  ;;  %3101 = vmatprep.mubr.msk.f32.mxu0 %vm315_vm1, %v3661_v6  ;;  %v3717_v16 = vsel %vm1648_vm2, %v1649_v11, %v1650_v12  ;;  %v3733_v20 = vld [vmem:[%s3652_s16 + $0x10] sm:$0x3]  ;;  %v3736_v21 = vld [vmem:[%s3652_s16 + $0x68] sm:$0xff]  ;;  %v3742_v23 = vld [vmem:[%s3652_s16 + $0x78] sm:$0xff]  ;;  %v1664_v29 = vrot.slane %v3705_v14, 2  ;;  %v1665_v33 = vrot.slane %v3714_v15, 2 }
  0x22   : > { %3127 = vmatprep.mubr.msk.f32.mxu1 %vm315_vm1, %v3688_v10  ;;  %3175 = vmatpush3.msk.msra.mxu1 %vm364_vm0, %v2795_v3  ;;  %v1652_v22 = vrot.slane %v3733_v20, 2  ;;  %v3749_v24 = vsel %vm1648_vm2, %v1654_v17, %v1655_v18  ;;  %v3760_v27 = vld [vmem:[%s3652_s16 + $0x80] sm:$0xff]  ;;  %v3767_v30 = vld [vmem:[%s3652_s16 + $0x90] sm:$0xff]  ;;  %v3775_v32 = vld [vmem:[%s3652_s16 + $0xc8] sm:$0xff]  ;;  %v1669_v34 = vrot.slane %v3724_v19, 2  ;;  %v1670_v35 = vrot.slane %v3736_v21, 2 }
  0x23   : > { %3200 = vmatprep.subr.msk.mxu0 %vm364_vm0, %v3677_v8  ;;  %3226 = vmatprep.subr.msk.mxu1 %vm364_vm0, %v3682_v9  ;;  %v3772_v31 = vld [vmem:[%s3652_s16 + $0xc0] sm:$0xff]  ;;  %v1920_v37 = vrot.slane %v3775_v32, 2  ;;  %v3789_v38 = vsel %vm1648_vm2, %v1659_v26, %v1660_v28  ;;  %v1674_v39 = vrot.slane %v3742_v23, 2  ;;  %v3793_v40 = vld [vmem:[%s3652_s16 + $0x98] sm:$0xff]  ;;  %v3801_v42 = vsel %vm1648_vm2, %v1664_v29, %v1665_v33  ;;  %v3810_v45 = vld [vmem:[%s3652_s16 + $0xa8] sm:$0xff]  ;;  %s2654_s14 = sshll.u32 %s241_s13, 4  ;;  %s4398_s14 = int_to_ptr.vmem [resolvable:$true] %s2654_s14 }
  0x24   : > { %3102 = vmatmul.mubr.msk.f32.gmra.mxu0 %vm315_vm1, %v3666_v7  ;;  %3128 = vmatmul.mubr.msk.f32.gmra.mxu1 %vm315_vm1, %v3696_v13  ;;  %v3756_v25 = vsel %vm1648_vm2, %v1650_v12, %v1652_v22  ;;  %v1919_v36 = vrot.slane %v3772_v31, 2  ;;  %v3796_v41 = vld [vmem:[%s3652_s16 + $0xd8] sm:$0xff]  ;;  %v3806_v43 = vsel %vm1648_vm2, %v1669_v34, %v1670_v35  ;;  %v1675_v44 = vrot.slane %v3760_v27, 2  ;;  %v3813_v46 = vld [vmem:[%s3652_s16 + $0xb0] sm:$0xff]  ;;  %v3817_v48 = vld [vmem:[%s3652_s16 + $0xe0] sm:$0xff]  ;;  %s3430_s30 = scalar_lea.vmem %s4398_s14, 64 }
  0x25   : > { %3104 = vmatprep.mubr.msk.f32.mxu0 %vm315_vm1, %v3688_v10  ;;  %3130 = vmatprep.mubr.msk.f32.mxu1 %vm315_vm1, %v3705_v14  ;;  %v2126_v47 = vrot.slane %v3796_v41, 2  ;;  %v1679_v49 = vrot.slane %v3767_v30, 2  ;;  %v1680_v50 = vrot.slane %v3793_v40, 2  ;;  %v2127_v51 = vrot.slane %v3817_v48, 2  ;;  %v3838_v55 = vld [vmem:[%s3652_s16 + $0xd0] sm:$0x3]  ;;  %p3431_p0 = scmp.ne.s32.totalorder %s4398_s14, %s3430_s30 }
  0x26   : > { %v3829_v52 = vsel %vm1648_vm2, %v1674_v39, %v1675_v44  ;;  %v1684_v53 = vrot.slane %v3810_v45, 2  ;;  %v1685_v54 = vrot.slane %v3813_v46, 2  ;;  %v3846_v57 = vsel %vm1648_vm2, %v1919_v36, %v1920_v37  ;;  %v3861_v62 = vld [vmem:[%s3652_s16 + $0xe8] sm:$0x3]  ;;  %v3912_v29 = vld [vmem:[%s3652_s16 + $0x40] sm:$0x3] }
  0x27   : > { %v3843_v56 = vsel %vm1648_vm2, %v1679_v49, %v1680_v50  ;;  %v962_v58 = vrot.slane %v3655_v4, 1  ;;  %v963_v59 = vrot.slane %v3658_v5, 1  ;;  %v1922_v61 = vrot.slane %v3838_v55, 2  ;;  %v3877_v4 = vld [vmem:[%s3652_s16 + $0x28] sm:$0x3]  ;;  %p3432_p1 = pnand %p3431_p0, %p3607_p3  ;;  %s3525_s21 = smov [#allocation3]  }
  0x28   : > { %3105 = vmatmul.mubr.msk.f32.gmra.mxu0 %vm315_vm1, %v3696_v13  ;;  %3131 = vmatmul.mubr.msk.f32.gmra.mxu1 %vm315_vm1, %v3714_v15  ;;  %v3853_v60 = vsel %vm1648_vm2, %v1684_v53, %v1685_v54  ;;  %v3867_v0 = vsel %vm1648_vm2, %v2126_v47, %v2127_v51  ;;  %v965_v1 = vrot.slane %v3733_v20, 1  ;;  %v2129_v2 = vrot.slane %v3861_v62, 2  ;;  %v3923_v36 = vld [vmem:[%s4448_s1 + $0x8] sm:$0xf]  ;;  %s3434_s22 = sshll.u32 %s3525_s21, 4  ;;  %s3435_s22 = int_to_ptr.vmem [resolvable:$false] %s3434_s22 }
  0x29   : > { %3107 = vmatprep.mubr.msk.f32.mxu0 %vm315_vm1, %v3705_v14  ;;  %3133 = vmatprep.mubr.msk.f32.mxu1 %vm315_vm1, %v3724_v19  ;;  %v3864_v63 = vsel %vm1648_vm2, %v1920_v37, %v1922_v61  ;;  %v964_v3 = vsel %vm961_vm3, %v962_v58, %v963_v59  ;;  %v967_v5 = vrot.slane %v3661_v6, 1  ;;  %v968_v11 = vrot.slane %v3666_v7, 1  ;;  %v3968_v61 = vld [vmem:[%s3652_s16 + $0x70] sm:$0x3]  ;;  %p3433_p2 = pneg %p3432_p1  ;;  %s3436_s9 = scalar_lea.vmem %s3435_s22, 128 }
  0x2a   : > { %v3882_v12 = vsel %vm1648_vm2, %v2127_v51, %v2129_v2  ;;  %v966_v17 = vsel %vm961_vm3, %v963_v59, %v965_v1  ;;  %v970_v6 = vrot.slane %v3877_v4, 1  ;;  %v3524_v20 = vmov 0.0   ;;  %p3437_p4 = scmp.lt.s32.totalorder %s4398_s14, %s3435_s22  ;;  %p3438_p5 = scmp.lt.s32.totalorder %s3436_s9, %s3430_s30 }
  0x2b   : > { %283 = vst.msk [vmem:[#allocation2 + $0x8] sm:$0xff] %vm281_vm4, %v3524_v20  ;;  %282 = vst.msk [vmem:[#allocation2] sm:$0xff] %vm281_vm4, %v3524_v20  ;;  %v972_v22 = vrot.slane %v3688_v10, 1  ;;  %v973_v26 = vrot.slane %v3696_v13, 1  ;;  %v3915_v34 = vsel %vm961_vm3, %v967_v5, %v968_v11  ;;  %v975_v39 = vrot.slane %v3912_v29, 1 }
  0x2c   : > { %3108 = vmatmul.mubr.msk.f32.gmra.mxu0 %vm315_vm1, %v3714_v15  ;;  %3134 = vmatmul.mubr.msk.f32.gmra.mxu1 %vm315_vm1, %v3736_v21  ;;  %284 = vst.msk [vmem:[#allocation2 + $0x10] sm:$0xff] %vm281_vm4, %v3524_v20  ;;  %285 = vst.msk [vmem:[#allocation2 + $0x18] sm:$0xff] %vm281_vm4, %v3524_v20  ;;  %v3935_v37 = vsel %vm961_vm3, %v968_v11, %v970_v6  ;;  %v977_v49 = vrot.slane %v3705_v14, 1  ;;  %v978_v51 = vrot.slane %v3714_v15, 1  ;;  %v982_v58 = vrot.slane %v3724_v19, 1  ;;  %p3439_p6 = por %p3438_p5, %p3437_p4 }
  0x2d   : > { %3110 = vmatprep.mubr.msk.f32.mxu0 %vm315_vm1, %v3724_v19  ;;  %3136 = vmatprep.mubr.msk.f32.mxu1 %vm315_vm1, %v3742_v23  ;;  %286 = vst.msk [vmem:[#allocation2 + $0x20] sm:$0xff] %vm281_vm4, %v3524_v20  ;;  %287 = vst.msk [vmem:[#allocation2 + $0x28] sm:$0xff] %vm281_vm4, %v3524_v20  ;;  %v3941_v47 = vsel %vm961_vm3, %v972_v22, %v973_v26  ;;  %v983_v59 = vrot.slane %v3736_v21, 1  ;;  %v985_v2 = vrot.slane %v3968_v61, 1  ;;  %v988_v5 = vrot.slane %v3760_v27, 1 }
  0x2e   : > { %288 = vst.msk [vmem:[#allocation2 + $0x30] sm:$0xff] %vm281_vm4, %v3524_v20  ;;  %289 = vst.msk [vmem:[#allocation2 + $0x38] sm:$0xff] %vm281_vm4, %v3524_v20  ;;  %v979_v53 = vsel %vm961_vm3, %v977_v49, %v978_v51  ;;  %v3982_v11 = vld [vmem:[%s3652_s16 + $0x88] sm:$0x3]  ;;  %v993_v22 = vrot.slane %v3793_v40, 1  ;;  %p3440_p7 = pnand %p3439_p6, %p3433_p2 }
  0x2f   : > { %290 = vst.msk [vmem:[#allocation2 + $0x40] sm:$0xff] %vm281_vm4, %v3524_v20  ;;  %291 = vst.msk [vmem:[#allocation2 + $0x48] sm:$0xff] %vm281_vm4, %v3524_v20  ;;  %v990_v6 = vrot.slane %v3982_v11, 1 }
  0x30   : > { %3111 = vmatmul.mubr.msk.f32.gmra.mxu0 %vm315_vm1, %v3736_v21  ;;  %3137 = vmatmul.mubr.msk.f32.gmra.mxu1 %vm315_vm1, %v3760_v27  ;;  %292 = vst.msk [vmem:[#allocation2 + $0x50] sm:$0xff] %vm281_vm4, %v3524_v20  ;;  %293 = vst.msk [vmem:[#allocation2 + $0x58] sm:$0xff] %vm281_vm4, %v3524_v20 }
  0x31   : > { %3113 = vmatprep.mubr.msk.f32.mxu0 %vm315_vm1, %v3742_v23  ;;  %3139 = vmatprep.mubr.msk.f32.mxu1 %vm315_vm1, %v3767_v30  ;;  %294 = vst.msk [vmem:[#allocation2 + $0x60] sm:$0xff] %vm281_vm4, %v3524_v20  ;;  %295 = vst.msk [vmem:[#allocation2 + $0x68] sm:$0xff] %vm281_vm4, %v3524_v20 }
  0x32   : > { %296 = vst.msk [vmem:[#allocation2 + $0x70] sm:$0xff] %vm281_vm4, %v3524_v20  ;;  %297 = vst.msk [vmem:[#allocation2 + $0x78] sm:$0xff] %vm281_vm4, %v3524_v20  ;;  %v992_v20 = vrot.slane %v3767_v30, 1 }
  0x34   : > { %3114 = vmatmul.mubr.msk.f32.gmra.mxu0 %vm315_vm1, %v3760_v27  ;;  %3140 = vmatmul.mubr.msk.f32.gmra.mxu1 %vm315_vm1, %v3793_v40 }
  0x35   : > { %3116 = vmatprep.mubr.msk.f32.mxu0 %vm315_vm1, %v3767_v30  ;;  %3142 = vmatprep.mubr.msk.f32.mxu1 %vm315_vm1, %v3810_v45 }
  0x38   : > { %3117 = vmatmul.mubr.msk.f32.gmra.mxu0 %vm315_vm1, %v3793_v40  ;;  %3143 = vmatmul.mubr.msk.f32.gmra.mxu1 %vm315_vm1, %v3813_v46 }
  0x39   : > { %3119 = vmatprep.mubr.msk.f32.mxu0 %vm315_vm1, %v3810_v45  ;;  %3145 = vmatprep.mubr.msk.f32.mxu1 %vm315_vm1, %v3772_v31 }
  0x3c   : > { %3120 = vmatmul.mubr.msk.f32.gmra.mxu0 %vm315_vm1, %v3813_v46  ;;  %3146 = vmatmul.mubr.msk.f32.gmra.mxu1 %vm315_vm1, %v3775_v32 }
  0x3d   : > { %3150 = vmatprep.mubr.msk.f32.mxu0 %vm315_vm1, %v3688_v10  ;;  %3176 = vmatprep.mubr.msk.f32.mxu1 %vm315_vm1, %v964_v3  ;;  %v3928_v10 = vld [vmem:[%s4448_s1 + $0x14] sm:$0xf]  ;;  %v987_v3 = vrot.slane %v3742_v23, 1 }
  0x40   : > { %3151 = vmatmul.mubr.msk.f32.vlgmr.msra.gmra.mxu0 %vm315_vm1, %v3696_v13  ;;  %3177 = vmatmul.mubr.msk.f32.vlgmr.msra.gmra.mxu1 %vm315_vm1, %v966_v17  ;;  %v986_v17 = vsel %vm961_vm3, %v983_v59, %v985_v2  ;;  %v1672_v13 = vrot.slane %v3968_v61, 2  ;;  %v302_v61 = vld [vmem:[#allocation2 + $0x20] sm:$0xff] }
  0x41   : > { %3201 = vmatpush3.msk.msra.mxu0 %vm364_vm0, %v3677_v8  ;;  %3153 = vmatprep.mubr.msk.f32.mxu0 %vm315_vm1, %v3705_v14  ;;  %v3946_v8 = vld [vmem:[%s3652_s16 + $0x58] sm:$0x3] }
  0x42   : > { %3179 = vmatprep.mubr.msk.f32.mxu1 %vm315_vm1, %v3915_v34  ;;  %3227 = vmatpush3.msk.msra.mxu1 %vm364_vm0, %v3682_v9  ;;  %v976_v9 = vsel %vm961_vm3, %v973_v26, %v975_v39  ;;  %v980_v14 = vrot.slane %v3946_v8, 1  ;;  %v3996_v26 = vld [vmem:[%s3652_s16 + $0xa0] sm:$0x3]  ;;  %v991_v39 = vsel %vm961_vm3, %v988_v5, %v990_v6  ;;  %v305_v6 = vld [vmem:[#allocation2 + $0x38] sm:$0xff] }
  0x43   : > { %3252 = vmatprep.subr.msk.mxu0 %vm364_vm0, %v3923_v36  ;;  %3278 = vmatprep.subr.msk.mxu1 %vm364_vm0, %v3928_v10  ;;  %v995_v49 = vrot.slane %v3996_v26, 1 }
  0x44   : > { %3154 = vmatmul.mubr.msk.f32.gmra.mxu0 %vm315_vm1, %v3714_v15  ;;  %3180 = vmatmul.mubr.msk.f32.gmra.mxu1 %vm315_vm1, %v3935_v37  ;;  %v981_v1 = vsel %vm961_vm3, %v978_v51, %v980_v14  ;;  %v997_v51 = vrot.slane %v3810_v45, 1  ;;  %v998_v14 = vrot.slane %v3813_v46, 1  ;;  %v1677_v15 = vrot.slane %v3982_v11, 2 }
  0x45   : > { %3156 = vmatprep.mubr.msk.f32.mxu0 %vm315_vm1, %v3724_v19  ;;  %3182 = vmatprep.mubr.msk.f32.mxu1 %vm315_vm1, %v3941_v47  ;;  %v984_v19 = vsel %vm961_vm3, %v982_v58, %v983_v59  ;;  %v4010_v58 = vld [vmem:[%s3652_s16 + $0xb8] sm:$0x3]  ;;  %v996_v59 = vsel %vm961_vm3, %v993_v22, %v995_v49  ;;  %v304_v49 = vld [vmem:[#allocation2 + $0x30] sm:$0xff] }
  0x46   : > { %v1000_v2 = vrot.slane %v4010_v58, 1 }
  0x48   : > { %3157 = vmatmul.mubr.msk.f32.gmra.mxu0 %vm315_vm1, %v3736_v21  ;;  %3183 = vmatmul.mubr.msk.f32.gmra.mxu1 %vm315_vm1, %v976_v9  ;;  %v1682_v21 = vrot.slane %v3996_v26, 2 }
  0x49   : > { %3159 = vmatprep.mubr.msk.f32.mxu0 %vm315_vm1, %v3742_v23  ;;  %3185 = vmatprep.mubr.msk.f32.mxu1 %vm315_vm1, %v979_v53  ;;  %v989_v23 = vsel %vm961_vm3, %v987_v3, %v988_v5  ;;  %v1001_v3 = vsel %vm961_vm3, %v998_v14, %v1000_v2  ;;  %v2885_v5 = vld [vmem:[%s4448_s1 + $0x20] sm:$0xf]  ;;  %v307_v2 = vld [vmem:[#allocation2 + $0x48] sm:$0xff] }
  0x4c   : > { %3160 = vmatmul.mubr.msk.f32.gmra.mxu0 %vm315_vm1, %v3760_v27  ;;  %3186 = vmatmul.mubr.msk.f32.gmra.mxu1 %vm315_vm1, %v981_v1  ;;  %v1687_v27 = vrot.slane %v4010_v58, 2 }
  0x4d   : > { %3162 = vmatprep.mubr.msk.f32.mxu0 %vm315_vm1, %v3767_v30  ;;  %3188 = vmatprep.mubr.msk.f32.mxu1 %vm315_vm1, %v984_v19  ;;  %v994_v30 = vsel %vm961_vm3, %v992_v20, %v993_v22 }
  0x50   : > { %3163 = vmatmul.mubr.msk.f32.gmra.mxu0 %vm315_vm1, %v3793_v40  ;;  %3189 = vmatmul.mubr.msk.f32.gmra.mxu1 %vm315_vm1, %v986_v17 }
  0x51   : > { %3165 = vmatprep.mubr.msk.f32.mxu0 %vm315_vm1, %v3810_v45  ;;  %3191 = vmatprep.mubr.msk.f32.mxu1 %vm315_vm1, %v989_v23  ;;  %v999_v45 = vsel %vm961_vm3, %v997_v51, %v998_v14 }
  0x54   : > { %3166 = vmatmul.mubr.msk.f32.gmra.mxu0 %vm315_vm1, %v3813_v46  ;;  %3192 = vmatmul.mubr.msk.f32.gmra.mxu1 %vm315_vm1, %v991_v39 }
  0x55   : > { %3168 = vmatprep.mubr.msk.f32.mxu0 %vm315_vm1, %v3772_v31  ;;  %3194 = vmatprep.mubr.msk.f32.mxu1 %vm315_vm1, %v994_v30 }
  0x58   : > { %3169 = vmatmul.mubr.msk.f32.gmra.mxu0 %vm315_vm1, %v3775_v32  ;;  %3195 = vmatmul.mubr.msk.f32.gmra.mxu1 %vm315_vm1, %v996_v59 }
  0x59   : > { %3171 = vmatprep.mubr.msk.f32.mxu0 %vm315_vm1, %v3796_v41  ;;  %3197 = vmatprep.mubr.msk.f32.mxu1 %vm315_vm1, %v999_v45 }
  0x5c   : > { %3172 = vmatmul.mubr.msk.f32.gmra.mxu0 %vm315_vm1, %v3817_v48  ;;  %3198 = vmatmul.mubr.msk.f32.gmra.mxu1 %vm315_vm1, %v1001_v3 }
  0x5d   : > { %3202 = vmatprep.mubr.msk.f32.mxu0 %vm315_vm1, %v3915_v34  ;;  %3228 = vmatprep.mubr.msk.f32.mxu1 %vm315_vm1, %v3941_v47  ;;  %v1233_v34 = vrot.slane %v3772_v31, 1 }
  0x60   : > { %3203 = vmatmul.mubr.msk.f32.vlgmr.msra.gmra.mxu0 %vm315_vm1, %v3935_v37  ;;  %3229 = vmatmul.mubr.msk.f32.vlgmr.msra.gmra.mxu1 %vm315_vm1, %v976_v9  ;;  %v1442_v37 = vrot.slane %v3817_v48, 1 }
  0x61   : > { %3253 = vmatpush3.msk.msra.mxu0 %vm364_vm0, %v3923_v36  ;;  %3205 = vmatprep.mubr.msk.f32.mxu0 %vm315_vm1, %v3941_v47  ;;  %v1234_v36 = vrot.slane %v3775_v32, 1  ;;  %v1236_v47 = vrot.slane %v3838_v55, 1  ;;  %v1444_v32 = vrot.slane %v3861_v62, 1  ;;  %v1657_v55 = vrot.slane %v3877_v4, 2  ;;  %v303_v4 = vld [vmem:[#allocation2 + $0x28] sm:$0xff] }
  0x62   : > { %3231 = vmatprep.mubr.msk.f32.mxu1 %vm315_vm1, %v979_v53  ;;  %3279 = vmatpush3.msk.msra.mxu1 %vm364_vm0, %v3928_v10  ;;  %v1441_v10 = vrot.slane %v3796_v41, 1 }
  0x63   : > { %3304 = vmatprep.subr.msk.mxu0 %vm364_vm0, %v2885_v5  ;;  %v1235_v31 = vsel %vm961_vm3, %v1233_v34, %v1234_v36  ;;  %v1237_v41 = vsel %vm961_vm3, %v1234_v36, %v1236_v47  ;;  %v1445_v48 = vsel %vm961_vm3, %v1442_v37, %v1444_v32  ;;  %v1658_v62 = vsel %vm1648_vm2, %v1655_v18, %v1657_v55 }
  0x64   : > { %3206 = vmatmul.mubr.msk.f32.gmra.mxu0 %vm315_vm1, %v976_v9  ;;  %3232 = vmatmul.mubr.msk.f32.gmra.mxu1 %vm315_vm1, %v981_v1  ;;  %v1443_v9 = vsel %vm961_vm3, %v1441_v10, %v1442_v37  ;;  %v306_v10 = vld [vmem:[#allocation2 + $0x40] sm:$0xff] }
  0x65   : > { %3208 = vmatprep.mubr.msk.f32.mxu0 %vm315_vm1, %v979_v53  ;;  %3234 = vmatprep.mubr.msk.f32.mxu1 %vm315_vm1, %v984_v19  ;;  %v1662_v53 = vrot.slane %v3912_v29, 2 }
  0x67   : > { %v1663_v7 = vsel %vm1648_vm2, %v1660_v28, %v1662_v53  ;;  %v1683_v28 = vsel %vm1648_vm2, %v1680_v50, %v1682_v21  ;;  %v301_v50 = vld [vmem:[#allocation2 + $0x18] sm:$0xff]  ;;  %v311_v21 = vld [vmem:[#allocation2 + $0x68] sm:$0xff] }
  0x68   : > { %3209 = vmatmul.mubr.msk.f32.gmra.mxu0 %vm315_vm1, %v981_v1  ;;  %3235 = vmatmul.mubr.msk.f32.gmra.mxu1 %vm315_vm1, %v986_v17 }
  0x69   : > { %3211 = vmatprep.mubr.msk.f32.mxu0 %vm315_vm1, %v984_v19  ;;  %3237 = vmatprep.mubr.msk.f32.mxu1 %vm315_vm1, %v989_v23 }
  0x6c   : > { %3212 = vmatmul.mubr.msk.f32.gmra.mxu0 %vm315_vm1, %v986_v17  ;;  %3238 = vmatmul.mubr.msk.f32.gmra.mxu1 %vm315_vm1, %v991_v39 }
  0x6d   : > { %3214 = vmatprep.mubr.msk.f32.mxu0 %vm315_vm1, %v989_v23  ;;  %3240 = vmatprep.mubr.msk.f32.mxu1 %vm315_vm1, %v994_v30 }
  0x70   : > { %3215 = vmatmul.mubr.msk.f32.gmra.mxu0 %vm315_vm1, %v991_v39  ;;  %3241 = vmatmul.mubr.msk.f32.gmra.mxu1 %vm315_vm1, %v996_v59 }
  0x71   : > { %3217 = vmatprep.mubr.msk.f32.mxu0 %vm315_vm1, %v994_v30  ;;  %3243 = vmatprep.mubr.msk.f32.mxu1 %vm315_vm1, %v999_v45 }
  0x74   : > { %3218 = vmatmul.mubr.msk.f32.gmra.mxu0 %vm315_vm1, %v996_v59  ;;  %3244 = vmatmul.mubr.msk.f32.gmra.mxu1 %vm315_vm1, %v1001_v3 }
  0x75   : > { %3220 = vmatprep.mubr.msk.f32.mxu0 %vm315_vm1, %v999_v45  ;;  %3246 = vmatprep.mubr.msk.f32.mxu1 %vm315_vm1, %v1235_v31 }
  0x78   : > { %3221 = vmatmul.mubr.msk.f32.gmra.mxu0 %vm315_vm1, %v1001_v3  ;;  %3247 = vmatmul.mubr.msk.f32.gmra.mxu1 %vm315_vm1, %v1237_v41 }
  0x79   : > { %3223 = vmatprep.mubr.msk.f32.mxu0 %vm315_vm1, %v1235_v31  ;;  %3249 = vmatprep.mubr.msk.f32.mxu1 %vm315_vm1, %v1443_v9 }
  0x7c   : > { %3224 = vmatmul.mubr.msk.f32.gmra.mxu0 %vm315_vm1, %v1237_v41  ;;  %3250 = vmatmul.mubr.msk.f32.gmra.mxu1 %vm315_vm1, %v1445_v48  ;;  %v309_v41 = vld [vmem:[#allocation2 + $0x58] sm:$0xff] }
  0x7d   : > { %3254 = vmatprep.mubr.msk.f32.mxu0 %vm315_vm1, %v3717_v16  ;;  %3280 = vmatprep.mubr.msk.f32.mxu1 %vm315_vm1, %v3749_v24  ;;  %v1667_v16 = vrot.slane %v3946_v8, 2 }
  0x7f   : > { %v1668_v18 = vsel %vm1648_vm2, %v1665_v33, %v1667_v16  ;;  %v1688_v33 = vsel %vm1648_vm2, %v1685_v54, %v1687_v27  ;;  %v308_v16 = vld [vmem:[#allocation2 + $0x50] sm:$0xff] }
  0x80   : > { %3255 = vmatmul.mubr.msk.f32.vlgmr.msra.gmra.mxu0 %vm315_vm1, %v3756_v25  ;;  %3281 = vmatmul.mubr.msk.f32.vlgmr.msra.gmra.mxu1 %vm315_vm1, %v1658_v62  ;;  %v1678_v25 = vsel %vm1648_vm2, %v1675_v44, %v1677_v15 }
  0x81   : > { %3305 = vmatpush3.msk.msra.mxu0 %vm364_vm0, %v2885_v5  ;;  %3257 = vmatprep.mubr.msk.f32.mxu0 %vm315_vm1, %v3749_v24  ;;  %v1673_v24 = vsel %vm1648_vm2, %v1670_v35, %v1672_v13  ;;  %v2411_v35 = vld [vmem:[%s4451_s4] sm:$0xff] }
  0x82   : > { %3283 = vmatprep.mubr.msk.f32.mxu1 %vm315_vm1, %v3789_v38  ;;  %3330 = vmatprep.subr.mxu1 %v2411_v35 }
  0x83   : > { %3331 = vmatpush3.msra.mxu1 %v2411_v35 }
  0x84   : > { %3258 = vmatmul.mubr.msk.f32.gmra.mxu0 %vm315_vm1, %v1658_v62  ;;  %3284 = vmatmul.mubr.msk.f32.gmra.mxu1 %vm315_vm1, %v1663_v7 }
  0x85   : > { %3260 = vmatprep.mubr.msk.f32.mxu0 %vm315_vm1, %v3789_v38  ;;  %3286 = vmatprep.mubr.msk.f32.mxu1 %vm315_vm1, %v3801_v42 }
  0x88   : > { %3261 = vmatmul.mubr.msk.f32.gmra.mxu0 %vm315_vm1, %v1663_v7  ;;  %3287 = vmatmul.mubr.msk.f32.gmra.mxu1 %vm315_vm1, %v1668_v18 }
  0x89   : > { %3263 = vmatprep.mubr.msk.f32.mxu0 %vm315_vm1, %v3801_v42  ;;  %3289 = vmatprep.mubr.msk.f32.mxu1 %vm315_vm1, %v3806_v43 }
  0x8c   : > { %3264 = vmatmul.mubr.msk.f32.gmra.mxu0 %vm315_vm1, %v1668_v18  ;;  %3290 = vmatmul.mubr.msk.f32.gmra.mxu1 %vm315_vm1, %v1673_v24 }
  0x8d   : > { %3266 = vmatprep.mubr.msk.f32.mxu0 %vm315_vm1, %v3806_v43  ;;  %3292 = vmatprep.mubr.msk.f32.mxu1 %vm315_vm1, %v3829_v52 }
  0x90   : > { %3267 = vmatmul.mubr.msk.f32.gmra.mxu0 %vm315_vm1, %v1673_v24  ;;  %3293 = vmatmul.mubr.msk.f32.gmra.mxu1 %vm315_vm1, %v1678_v25 }
  0x91   : > { %3269 = vmatprep.mubr.msk.f32.mxu0 %vm315_vm1, %v3829_v52  ;;  %3295 = vmatprep.mubr.msk.f32.mxu1 %vm315_vm1, %v3843_v56 }
  0x94   : > { %3270 = vmatmul.mubr.msk.f32.gmra.mxu0 %vm315_vm1, %v1678_v25  ;;  %3296 = vmatmul.mubr.msk.f32.gmra.mxu1 %vm315_vm1, %v1683_v28 }
  0x95   : > { %3272 = vmatprep.mubr.msk.f32.mxu0 %vm315_vm1, %v3843_v56  ;;  %3298 = vmatprep.mubr.msk.f32.mxu1 %vm315_vm1, %v3853_v60 }
  0x98   : > { %3273 = vmatmul.mubr.msk.f32.gmra.mxu0 %vm315_vm1, %v1683_v28  ;;  %3299 = vmatmul.mubr.msk.f32.gmra.mxu1 %vm315_vm1, %v1688_v33 }
  0x99   : > { %3275 = vmatprep.mubr.msk.f32.mxu0 %vm315_vm1, %v3853_v60  ;;  %3301 = vmatprep.mubr.msk.f32.mxu1 %vm315_vm1, %v3846_v57 }
  0x9c   : > { %3276 = vmatmul.mubr.msk.f32.gmra.mxu0 %vm315_vm1, %v1688_v33  ;;  %3302 = vmatmul.mubr.msk.f32.gmra.mxu1 %vm315_vm1, %v3864_v63 }
  0x9d   : > { %3306 = vmatprep.mubr.msk.f32.mxu0 %vm315_vm1, %v3789_v38  ;;  %v299_v38 = vld [vmem:[#allocation2 + $0x8] sm:$0xff] }
  0xa0   : > { %3307 = vmatmul.mubr.msk.f32.vlgmr.msra.gmra.mxu0 %vm315_vm1, %v1663_v7 }
  0xa1   : > { %3309 = vmatprep.mubr.msk.f32.mxu0 %vm315_vm1, %v3801_v42  ;;  %v298_v42 = vld [vmem:[#allocation2] sm:$0xff] }
  0xa4   : > { %3310 = vmatmul.mubr.msk.f32.gmra.mxu0 %vm315_vm1, %v1668_v18 }
  0xa5   : > { %3312 = vmatprep.mubr.msk.f32.mxu0 %vm315_vm1, %v3806_v43 }
  0xa8   : > { %3313 = vmatmul.mubr.msk.f32.gmra.mxu0 %vm315_vm1, %v1673_v24 }
  0xa9   : > { %3315 = vmatprep.mubr.msk.f32.mxu0 %vm315_vm1, %v3829_v52 }
  0xac   : > { %3316 = vmatmul.mubr.msk.f32.gmra.mxu0 %vm315_vm1, %v1678_v25 }
  0xad   : > { %3318 = vmatprep.mubr.msk.f32.mxu0 %vm315_vm1, %v3843_v56 }
  0xb0   : > { %3319 = vmatmul.mubr.msk.f32.gmra.mxu0 %vm315_vm1, %v1683_v28 }
  0xb1   : > { %3321 = vmatprep.mubr.msk.f32.mxu0 %vm315_vm1, %v3853_v60 }
  0xb4   : > { %3322 = vmatmul.mubr.msk.f32.gmra.mxu0 %vm315_vm1, %v1688_v33 }
  0xb5   : > { %3324 = vmatprep.mubr.msk.f32.mxu0 %vm315_vm1, %v3846_v57  ;;  %v300_v57 = vld [vmem:[#allocation2 + $0x10] sm:$0xff] }
  0xb8   : > { %3325 = vmatmul.mubr.msk.f32.gmra.mxu0 %vm315_vm1, %v3864_v63 }
  0xb9   : > { %3327 = vmatprep.mubr.msk.f32.mxu0 %vm315_vm1, %v3867_v0 }
  0xbc   : > { %3328 = vmatmul.mubr.msk.f32.gmra.mxu0 %vm315_vm1, %v3882_v12 }
  0xe0   : > { %v3100_v40 = vpop.f32.mrf.mxu0  ;;  %v3126_v43 = vpop.f32.mrf.mxu1 }
  0xe1   : > { %v514_v44 = vadd.f32 %v3100_v40, %v299_v38  ;;  %v310_v40 = vld [vmem:[#allocation2 + $0x60] sm:$0xff] }
  0xe2   : > { %v434_v46 = vpop.f32.mrf.mxu0  ;;  %v638_v52 = vpop.f32.mrf.mxu1 }
  0xe3   : > { %530 = vst.msk [vmem:[#allocation2 + $0x8] sm:$0xff] %vm281_vm4, %v514_v44  ;;  %v513_v54 = vadd.f32 %v434_v46, %v298_v42 }
  0xe4   : > { %v3103_v56 = vpop.f32.mrf.mxu0  ;;  %v3129_v60 = vpop.f32.mrf.mxu1 }
  0xe5   : > { %529 = vst.msk [vmem:[#allocation2] sm:$0xff] %vm281_vm4, %v513_v54  ;;  %v516_v63 = vadd.f32 %v3103_v56, %v301_v50 }
  0xe6   : > { %v444_v0 = vpop.f32.mrf.mxu0  ;;  %v648_v12 = vpop.f32.mrf.mxu1 }
  0xe7   : > { %532 = vst.msk [vmem:[#allocation2 + $0x18] sm:$0xff] %vm281_vm4, %v516_v63  ;;  %v515_v29 = vadd.f32 %v444_v0, %v300_v57  ;;  %v312_v0 = vld [vmem:[#allocation2 + $0x70] sm:$0xff] }
  0xe8   : > { %v3106_v8 = vpop.f32.mrf.mxu0  ;;  %v3132_v1 = vpop.f32.mrf.mxu1 }
  0xe9   : > { %531 = vst.msk [vmem:[#allocation2 + $0x10] sm:$0xff] %vm281_vm4, %v515_v29  ;;  %v518_v19 = vadd.f32 %v3106_v8, %v303_v4 }
  0xea   : > { %v454_v11 = vpop.f32.mrf.mxu0  ;;  %v546_v17 = vld [vmem:[#allocation2 + $0x8] sm:$0xff]  ;;  %v658_v23 = vpop.f32.mrf.mxu1 }
  0xeb   : > { %534 = vst.msk [vmem:[#allocation2 + $0x28] sm:$0xff] %vm281_vm4, %v518_v19  ;;  %v517_v20 = vadd.f32 %v454_v11, %v302_v61  ;;  %v718_v22 = vadd.f32 %v3126_v43, %v546_v17 }
  0xec   : > { %v3109_v26 = vpop.f32.mrf.mxu0  ;;  %v545_v39 = vld [vmem:[#allocation2] sm:$0xff]  ;;  %v3135_v30 = vpop.f32.mrf.mxu1 }
  0xed   : > { %533 = vst.msk [vmem:[#allocation2 + $0x20] sm:$0xff] %vm281_vm4, %v517_v20  ;;  %734 = vst.msk [vmem:[#allocation2 + $0x8] sm:$0xff] %vm281_vm4, %v718_v22  ;;  %v520_v51 = vadd.f32 %v3109_v26, %v305_v6  ;;  %v717_v14 = vadd.f32 %v638_v52, %v545_v39  ;;  %v313_v52 = vld [vmem:[#allocation2 + $0x78] sm:$0xff] }
  0xee   : > { %v464_v58 = vpop.f32.mrf.mxu0  ;;  %v548_v59 = vld [vmem:[#allocation2 + $0x18] sm:$0xff]  ;;  %v668_v45 = vpop.f32.mrf.mxu1 }
  0xef   : > { %536 = vst.msk [vmem:[#allocation2 + $0x38] sm:$0xff] %vm281_vm4, %v520_v51  ;;  %733 = vst.msk [vmem:[#allocation2] sm:$0xff] %vm281_vm4, %v717_v14  ;;  %v519_v3 = vadd.f32 %v464_v58, %v304_v49  ;;  %v720_v5 = vadd.f32 %v3129_v60, %v548_v59 }
  0xf0   : > { %v3112_v34 = vpop.f32.mrf.mxu0  ;;  %v547_v36 = vld [vmem:[#allocation2 + $0x10] sm:$0xff]  ;;  %v3138_v37 = vpop.f32.mrf.mxu1 }
  0xf1   : > { %535 = vst.msk [vmem:[#allocation2 + $0x30] sm:$0xff] %vm281_vm4, %v519_v3  ;;  %736 = vst.msk [vmem:[#allocation2 + $0x18] sm:$0xff] %vm281_vm4, %v720_v5  ;;  %v522_v47 = vadd.f32 %v3112_v34, %v307_v2  ;;  %v719_v31 = vadd.f32 %v648_v12, %v547_v36 }
  0xf2   : > { %v474_v32 = vpop.f32.mrf.mxu0  ;;  %v550_v9 = vld [vmem:[#allocation2 + $0x28] sm:$0xff]  ;;  %v678_v48 = vpop.f32.mrf.mxu1 }
  0xf3   : > { %538 = vst.msk [vmem:[#allocation2 + $0x48] sm:$0xff] %vm281_vm4, %v522_v47  ;;  %735 = vst.msk [vmem:[#allocation2 + $0x10] sm:$0xff] %vm281_vm4, %v719_v31  ;;  %v521_v55 = vadd.f32 %v474_v32, %v306_v10  ;;  %v722_v62 = vadd.f32 %v3132_v1, %v550_v9 }
  0xf4   : > { %v3115_v53 = vpop.f32.mrf.mxu0  ;;  %v549_v7 = vld [vmem:[#allocation2 + $0x20] sm:$0xff]  ;;  %v3141_v18 = vpop.f32.mrf.mxu1  ;;  %v750_v6 = vld [vmem:[#allocation2 + $0x8] sm:$0xff] }
  0xf5   : > { %537 = vst.msk [vmem:[#allocation2 + $0x40] sm:$0xff] %vm281_vm4, %v521_v55  ;;  %738 = vst.msk [vmem:[#allocation2 + $0x28] sm:$0xff] %vm281_vm4, %v722_v62  ;;  %v524_v13 = vadd.f32 %v3115_v53, %v309_v41  ;;  %v721_v24 = vadd.f32 %v658_v23, %v549_v7 }
  0xf6   : > { %v484_v15 = vpop.f32.mrf.mxu0  ;;  %v552_v25 = vld [vmem:[#allocation2 + $0x38] sm:$0xff]  ;;  %v688_v28 = vpop.f32.mrf.mxu1  ;;  %v749_v49 = vld [vmem:[#allocation2] sm:$0xff] }
  0xf7   : > { %540 = vst.msk [vmem:[#allocation2 + $0x58] sm:$0xff] %vm281_vm4, %v524_v13  ;;  %737 = vst.msk [vmem:[#allocation2 + $0x20] sm:$0xff] %vm281_vm4, %v721_v24  ;;  %v523_v27 = vadd.f32 %v484_v15, %v308_v16  ;;  %v724_v33 = vadd.f32 %v3135_v30, %v552_v25 }
  0xf8   : > { %v3118_v35 = vpop.f32.mrf.mxu0  ;;  %v551_v38 = vld [vmem:[#allocation2 + $0x30] sm:$0xff]  ;;  %v3144_v42 = vpop.f32.mrf.mxu1  ;;  %v752_v2 = vld [vmem:[#allocation2 + $0x18] sm:$0xff] }
  0xf9   : > { %539 = vst.msk [vmem:[#allocation2 + $0x50] sm:$0xff] %vm281_vm4, %v523_v27  ;;  %740 = vst.msk [vmem:[#allocation2 + $0x38] sm:$0xff] %vm281_vm4, %v724_v33  ;;  %v526_v43 = vadd.f32 %v3118_v35, %v311_v21  ;;  %v723_v44 = vadd.f32 %v668_v45, %v551_v38 }
  0xfa   : > { %v494_v46 = vpop.f32.mrf.mxu0  ;;  %v554_v50 = vld [vmem:[#allocation2 + $0x48] sm:$0xff]  ;;  %v698_v54 = vpop.f32.mrf.mxu1  ;;  %v751_v10 = vld [vmem:[#allocation2 + $0x10] sm:$0xff] }
  0xfb   : > { %542 = vst.msk [vmem:[#allocation2 + $0x68] sm:$0xff] %vm281_vm4, %v526_v43  ;;  %739 = vst.msk [vmem:[#allocation2 + $0x30] sm:$0xff] %vm281_vm4, %v723_v44  ;;  %v525_v56 = vadd.f32 %v494_v46, %v310_v40  ;;  %v726_v57 = vadd.f32 %v3138_v37, %v554_v50 }
  0xfc   : > { %v3121_v60 = vpop.f32.mrf.mxu0  ;;  %v553_v63 = vld [vmem:[#allocation2 + $0x40] sm:$0xff]  ;;  %v3147_v4 = vpop.f32.mrf.mxu1  ;;  %v754_v41 = vld [vmem:[#allocation2 + $0x28] sm:$0xff] }
  0xfd   : > { %541 = vst.msk [vmem:[#allocation2 + $0x60] sm:$0xff] %vm281_vm4, %v525_v56  ;;  %742 = vst.msk [vmem:[#allocation2 + $0x48] sm:$0xff] %vm281_vm4, %v726_v57  ;;  %v528_v12 = vadd.f32 %v3121_v60, %v313_v52  ;;  %v725_v29 = vadd.f32 %v678_v48, %v553_v63 }
  0xfe   : > { %v504_v8 = vpop.f32.mrf.mxu0  ;;  %v556_v61 = vld [vmem:[#allocation2 + $0x58] sm:$0xff]  ;;  %v708_v1 = vpop.f32.mrf.mxu1  ;;  %v753_v7 = vld [vmem:[#allocation2 + $0x20] sm:$0xff] }
  0xff   : > { %544 = vst.msk [vmem:[#allocation2 + $0x78] sm:$0xff] %vm281_vm4, %v528_v12  ;;  %741 = vst.msk [vmem:[#allocation2 + $0x40] sm:$0xff] %vm281_vm4, %v725_v29  ;;  %v527_v19 = vadd.f32 %v504_v8, %v312_v0  ;;  %v728_v11 = vadd.f32 %v3141_v18, %v556_v61 }
 0x100   : > { %v555_v17 = vld [vmem:[#allocation2 + $0x50] sm:$0xff]  ;;  %v3152_v23 = vpop.f32.mrf.mxu0  ;;  %v3178_v20 = vpop.f32.mrf.mxu1  ;;  %v756_v25 = vld [vmem:[#allocation2 + $0x38] sm:$0xff] }
 0x101   : > { %543 = vst.msk [vmem:[#allocation2 + $0x70] sm:$0xff] %vm281_vm4, %v527_v19  ;;  %744 = vst.msk [vmem:[#allocation2 + $0x58] sm:$0xff] %vm281_vm4, %v728_v11  ;;  %v727_v22 = vadd.f32 %v688_v28, %v555_v17  ;;  %v922_v26 = vadd.f32 %v3152_v23, %v750_v6 }
 0x102   : > { %v558_v39 = vld [vmem:[#allocation2 + $0x68] sm:$0xff]  ;;  %v842_v30 = vpop.f32.mrf.mxu0  ;;  %v1121_v51 = vpop.f32.mrf.mxu1  ;;  %v755_v38 = vld [vmem:[#allocation2 + $0x30] sm:$0xff] }
 0x103   : > { %743 = vst.msk [vmem:[#allocation2 + $0x50] sm:$0xff] %vm281_vm4, %v727_v22  ;;  %938 = vst.msk [vmem:[#allocation2 + $0x8] sm:$0xff] %vm281_vm4, %v922_v26  ;;  %v730_v14 = vadd.f32 %v3144_v42, %v558_v39  ;;  %v921_v58 = vadd.f32 %v842_v30, %v749_v49 }
 0x104   : > { %v557_v59 = vld [vmem:[#allocation2 + $0x60] sm:$0xff]  ;;  %v3155_v45 = vpop.f32.mrf.mxu0  ;;  %v3181_v3 = vpop.f32.mrf.mxu1  ;;  %v758_v50 = vld [vmem:[#allocation2 + $0x48] sm:$0xff] }
 0x105   : > { %746 = vst.msk [vmem:[#allocation2 + $0x68] sm:$0xff] %vm281_vm4, %v730_v14  ;;  %937 = vst.msk [vmem:[#allocation2] sm:$0xff] %vm281_vm4, %v921_v58  ;;  %v729_v5 = vadd.f32 %v698_v54, %v557_v59  ;;  %v924_v34 = vadd.f32 %v3155_v45, %v752_v2 }
 0x106   : > { %v560_v36 = vld [vmem:[#allocation2 + $0x78] sm:$0xff]  ;;  %v852_v37 = vpop.f32.mrf.mxu0  ;;  %v1131_v47 = vpop.f32.mrf.mxu1  ;;  %v757_v63 = vld [vmem:[#allocation2 + $0x40] sm:$0xff] }
 0x107   : > { %745 = vst.msk [vmem:[#allocation2 + $0x60] sm:$0xff] %vm281_vm4, %v729_v5  ;;  %940 = vst.msk [vmem:[#allocation2 + $0x18] sm:$0xff] %vm281_vm4, %v924_v34  ;;  %v732_v31 = vadd.f32 %v3147_v4, %v560_v36  ;;  %v923_v32 = vadd.f32 %v852_v37, %v751_v10 }
 0x108   : > { %v559_v9 = vld [vmem:[#allocation2 + $0x70] sm:$0xff]  ;;  %v3158_v48 = vpop.f32.mrf.mxu0  ;;  %v3184_v55 = vpop.f32.mrf.mxu1  ;;  %v760_v61 = vld [vmem:[#allocation2 + $0x58] sm:$0xff] }
 0x109   : > { %748 = vst.msk [vmem:[#allocation2 + $0x78] sm:$0xff] %vm281_vm4, %v732_v31  ;;  %939 = vst.msk [vmem:[#allocation2 + $0x10] sm:$0xff] %vm281_vm4, %v923_v32  ;;  %v731_v62 = vadd.f32 %v708_v1, %v559_v9  ;;  %v926_v53 = vadd.f32 %v3158_v48, %v754_v41 }
 0x10a   : > { %v862_v16 = vpop.f32.mrf.mxu0  ;;  %v1003_v18 = vld [vmem:[#allocation2 + $0x8] sm:$0xff]  ;;  %v1141_v13 = vpop.f32.mrf.mxu1  ;;  %v759_v23 = vld [vmem:[#allocation2 + $0x50] sm:$0xff] }
 0x10b   : > { %747 = vst.msk [vmem:[#allocation2 + $0x70] sm:$0xff] %vm281_vm4, %v731_v62  ;;  %942 = vst.msk [vmem:[#allocation2 + $0x28] sm:$0xff] %vm281_vm4, %v926_v53  ;;  %v925_v24 = vadd.f32 %v862_v16, %v753_v7  ;;  %v1201_v15 = vadd.f32 %v3178_v20, %v1003_v18 }
 0x10c   : > { %v3161_v21 = vpop.f32.mrf.mxu0  ;;  %v1002_v28 = vld [vmem:[#allocation2] sm:$0xff]  ;;  %v3187_v27 = vpop.f32.mrf.mxu1  ;;  %v762_v30 = vld [vmem:[#allocation2 + $0x68] sm:$0xff] }
 0x10d   : > { %941 = vst.msk [vmem:[#allocation2 + $0x20] sm:$0xff] %vm281_vm4, %v925_v24  ;;  %1217 = vst.msk [vmem:[#allocation2 + $0x8] sm:$0xff] %vm281_vm4, %v1201_v15  ;;  %v928_v33 = vadd.f32 %v3161_v21, %v756_v25  ;;  %v1200_v35 = vadd.f32 %v1121_v51, %v1002_v28 }
 0x10e   : > { %v872_v40 = vpop.f32.mrf.mxu0  ;;  %v1005_v42 = vld [vmem:[#allocation2 + $0x18] sm:$0xff]  ;;  %v1151_v43 = vpop.f32.mrf.mxu1  ;;  %v761_v45 = vld [vmem:[#allocation2 + $0x60] sm:$0xff] }
 0x10f   : > { %944 = vst.msk [vmem:[#allocation2 + $0x38] sm:$0xff] %vm281_vm4, %v928_v33  ;;  %1216 = vst.msk [vmem:[#allocation2] sm:$0xff] %vm281_vm4, %v1200_v35  ;;  %v927_v44 = vadd.f32 %v872_v40, %v755_v38  ;;  %v1203_v46 = vadd.f32 %v3181_v3, %v1005_v42 }
 0x110   : > { %v3164_v52 = vpop.f32.mrf.mxu0  ;;  %v1004_v54 = vld [vmem:[#allocation2 + $0x10] sm:$0xff]  ;;  %v3190_v56 = vpop.f32.mrf.mxu1  ;;  %v764_v37 = vld [vmem:[#allocation2 + $0x78] sm:$0xff] }
 0x111   : > { %943 = vst.msk [vmem:[#allocation2 + $0x30] sm:$0xff] %vm281_vm4, %v927_v44  ;;  %1219 = vst.msk [vmem:[#allocation2 + $0x18] sm:$0xff] %vm281_vm4, %v1203_v46  ;;  %v930_v57 = vadd.f32 %v3164_v52, %v758_v50  ;;  %v1202_v60 = vadd.f32 %v1131_v47, %v1004_v54 }
 0x112   : > { %v882_v0 = vpop.f32.mrf.mxu0  ;;  %v1007_v4 = vld [vmem:[#allocation2 + $0x28] sm:$0xff]  ;;  %v1161_v12 = vpop.f32.mrf.mxu1  ;;  %v763_v48 = vld [vmem:[#allocation2 + $0x70] sm:$0xff] }
 0x113   : > { %946 = vst.msk [vmem:[#allocation2 + $0x48] sm:$0xff] %vm281_vm4, %v930_v57  ;;  %1218 = vst.msk [vmem:[#allocation2 + $0x10] sm:$0xff] %vm281_vm4, %v1202_v60  ;;  %v929_v29 = vadd.f32 %v882_v0, %v757_v63  ;;  %v1205_v8 = vadd.f32 %v3184_v55, %v1007_v4 }
 0x114   : > { %v3167_v1 = vpop.f32.mrf.mxu0  ;;  %v1006_v19 = vld [vmem:[#allocation2 + $0x20] sm:$0xff]  ;;  %v3193_v11 = vpop.f32.mrf.mxu1 }
 0x115   : > { %945 = vst.msk [vmem:[#allocation2 + $0x40] sm:$0xff] %vm281_vm4, %v929_v29  ;;  %1221 = vst.msk [vmem:[#allocation2 + $0x28] sm:$0xff] %vm281_vm4, %v1205_v8  ;;  %v932_v17 = vadd.f32 %v3167_v1, %v760_v61  ;;  %v1204_v6 = vadd.f32 %v1141_v13, %v1006_v19  ;;  %v1239_v13 = vld [vmem:[#allocation2 + $0x8] sm:$0xff] }
 0x116   : > { %v892_v20 = vpop.f32.mrf.mxu0  ;;  %v1009_v22 = vld [vmem:[#allocation2 + $0x38] sm:$0xff]  ;;  %v1171_v26 = vpop.f32.mrf.mxu1 }
 0x117   : > { %948 = vst.msk [vmem:[#allocation2 + $0x58] sm:$0xff] %vm281_vm4, %v932_v17  ;;  %1220 = vst.msk [vmem:[#allocation2 + $0x20] sm:$0xff] %vm281_vm4, %v1204_v6  ;;  %v931_v39 = vadd.f32 %v892_v20, %v759_v23  ;;  %v1207_v49 = vadd.f32 %v3187_v27, %v1009_v22  ;;  %v1238_v27 = vld [vmem:[#allocation2] sm:$0xff] }
 0x118   : > { %v3170_v51 = vpop.f32.mrf.mxu0  ;;  %v1008_v14 = vld [vmem:[#allocation2 + $0x30] sm:$0xff]  ;;  %v3196_v58 = vpop.f32.mrf.mxu1 }
 0x119   : > { %947 = vst.msk [vmem:[#allocation2 + $0x50] sm:$0xff] %vm281_vm4, %v931_v39  ;;  %1223 = vst.msk [vmem:[#allocation2 + $0x38] sm:$0xff] %vm281_vm4, %v1207_v49  ;;  %v934_v59 = vadd.f32 %v3170_v51, %v762_v30  ;;  %v1206_v2 = vadd.f32 %v1151_v43, %v1008_v14  ;;  %v1241_v43 = vld [vmem:[#allocation2 + $0x18] sm:$0xff] }
 0x11a   : > { %v902_v3 = vpop.f32.mrf.mxu0  ;;  %v1011_v5 = vld [vmem:[#allocation2 + $0x48] sm:$0xff]  ;;  %v1181_v34 = vpop.f32.mrf.mxu1 }
 0x11b   : > { %950 = vst.msk [vmem:[#allocation2 + $0x68] sm:$0xff] %vm281_vm4, %v934_v59  ;;  %1222 = vst.msk [vmem:[#allocation2 + $0x30] sm:$0xff] %vm281_vm4, %v1206_v2  ;;  %v933_v36 = vadd.f32 %v902_v3, %v761_v45  ;;  %v1209_v10 = vadd.f32 %v3190_v56, %v1011_v5  ;;  %v1240_v56 = vld [vmem:[#allocation2 + $0x10] sm:$0xff] }
 0x11c   : > { %v3173_v47 = vpop.f32.mrf.mxu0  ;;  %v1010_v31 = vld [vmem:[#allocation2 + $0x40] sm:$0xff]  ;;  %v3199_v32 = vpop.f32.mrf.mxu1 }
 0x11d   : > { %949 = vst.msk [vmem:[#allocation2 + $0x60] sm:$0xff] %vm281_vm4, %v933_v36  ;;  %1225 = vst.msk [vmem:[#allocation2 + $0x48] sm:$0xff] %vm281_vm4, %v1209_v10  ;;  %v936_v9 = vadd.f32 %v3173_v47, %v764_v37  ;;  %v1208_v41 = vadd.f32 %v1161_v12, %v1010_v31  ;;  %v1243_v12 = vld [vmem:[#allocation2 + $0x28] sm:$0xff] }
 0x11e   : > { %v912_v55 = vpop.f32.mrf.mxu0  ;;  %v1013_v62 = vld [vmem:[#allocation2 + $0x58] sm:$0xff]  ;;  %v1191_v53 = vpop.f32.mrf.mxu1  ;;  %v1242_v19 = vld [vmem:[#allocation2 + $0x20] sm:$0xff] }
 0x11f   : > { %952 = vst.msk [vmem:[#allocation2 + $0x78] sm:$0xff] %vm281_vm4, %v936_v9  ;;  %1224 = vst.msk [vmem:[#allocation2 + $0x40] sm:$0xff] %vm281_vm4, %v1208_v41  ;;  %v935_v7 = vadd.f32 %v912_v55, %v763_v48  ;;  %v1211_v16 = vadd.f32 %v3193_v11, %v1013_v62 }
 0x120   : > { %v1012_v18 = vld [vmem:[#allocation2 + $0x50] sm:$0xff]  ;;  %v3204_v24 = vpop.f32.mrf.mxu0  ;;  %v3230_v15 = vpop.f32.mrf.mxu1  ;;  %v1245_v22 = vld [vmem:[#allocation2 + $0x38] sm:$0xff] }
 0x121   : > { %951 = vst.msk [vmem:[#allocation2 + $0x70] sm:$0xff] %vm281_vm4, %v935_v7  ;;  %1227 = vst.msk [vmem:[#allocation2 + $0x58] sm:$0xff] %vm281_vm4, %v1211_v16  ;;  %v1210_v25 = vadd.f32 %v1171_v26, %v1012_v18  ;;  %v1409_v21 = vadd.f32 %v3204_v24, %v1239_v13 }
 0x122   : > { %v1015_v28 = vld [vmem:[#allocation2 + $0x68] sm:$0xff]  ;;  %v1329_v33 = vpop.f32.mrf.mxu0  ;;  %v1537_v35 = vpop.f32.mrf.mxu1  ;;  %v1244_v14 = vld [vmem:[#allocation2 + $0x30] sm:$0xff] }
 0x123   : > { %1226 = vst.msk [vmem:[#allocation2 + $0x50] sm:$0xff] %vm281_vm4, %v1210_v25  ;;  %1425 = vst.msk [vmem:[#allocation2 + $0x8] sm:$0xff] %vm281_vm4, %v1409_v21  ;;  %v1213_v38 = vadd.f32 %v3196_v58, %v1015_v28  ;;  %v1408_v40 = vadd.f32 %v1329_v33, %v1238_v27 }
 0x124   : > { %v1014_v42 = vld [vmem:[#allocation2 + $0x60] sm:$0xff]  ;;  %v3207_v44 = vpop.f32.mrf.mxu0  ;;  %v3233_v46 = vpop.f32.mrf.mxu1  ;;  %v1247_v5 = vld [vmem:[#allocation2 + $0x48] sm:$0xff] }
 0x125   : > { %1229 = vst.msk [vmem:[#allocation2 + $0x68] sm:$0xff] %vm281_vm4, %v1213_v38  ;;  %1424 = vst.msk [vmem:[#allocation2] sm:$0xff] %vm281_vm4, %v1408_v40  ;;  %v1212_v50 = vadd.f32 %v1181_v34, %v1014_v42  ;;  %v1411_v52 = vadd.f32 %v3207_v44, %v1241_v43 }
 0x126   : > { %v1017_v54 = vld [vmem:[#allocation2 + $0x78] sm:$0xff]  ;;  %v1339_v57 = vpop.f32.mrf.mxu0  ;;  %v1547_v60 = vpop.f32.mrf.mxu1  ;;  %v1246_v31 = vld [vmem:[#allocation2 + $0x40] sm:$0xff] }
 0x127   : > { %1228 = vst.msk [vmem:[#allocation2 + $0x60] sm:$0xff] %vm281_vm4, %v1212_v50  ;;  %1427 = vst.msk [vmem:[#allocation2 + $0x18] sm:$0xff] %vm281_vm4, %v1411_v52  ;;  %v1215_v63 = vadd.f32 %v3199_v32, %v1017_v54  ;;  %v1410_v0 = vadd.f32 %v1339_v57, %v1240_v56 }
 0x128   : > { %v1016_v4 = vld [vmem:[#allocation2 + $0x70] sm:$0xff]  ;;  %v3210_v29 = vpop.f32.mrf.mxu0  ;;  %v3236_v8 = vpop.f32.mrf.mxu1  ;;  %v1249_v62 = vld [vmem:[#allocation2 + $0x58] sm:$0xff] }
 0x129   : > { %1231 = vst.msk [vmem:[#allocation2 + $0x78] sm:$0xff] %vm281_vm4, %v1215_v63  ;;  %1426 = vst.msk [vmem:[#allocation2 + $0x10] sm:$0xff] %vm281_vm4, %v1410_v0  ;;  %v1214_v61 = vadd.f32 %v1191_v53, %v1016_v4  ;;  %v1413_v1 = vadd.f32 %v3210_v29, %v1243_v12 }
 0x12a   : > { %v1349_v11 = vpop.f32.mrf.mxu0  ;;  %v1447_v17 = vld [vmem:[#allocation2 + $0x8] sm:$0xff]  ;;  %v1557_v6 = vpop.f32.mrf.mxu1  ;;  %v1248_v24 = vld [vmem:[#allocation2 + $0x50] sm:$0xff] }
 0x12b   : > { %1230 = vst.msk [vmem:[#allocation2 + $0x70] sm:$0xff] %vm281_vm4, %v1214_v61  ;;  %1429 = vst.msk [vmem:[#allocation2 + $0x28] sm:$0xff] %vm281_vm4, %v1413_v1  ;;  %v1412_v23 = vadd.f32 %v1349_v11, %v1242_v19  ;;  %v1617_v20 = vadd.f32 %v3230_v15, %v1447_v17 }
 0x12c   : > { %v3213_v26 = vpop.f32.mrf.mxu0  ;;  %v1446_v39 = vld [vmem:[#allocation2] sm:$0xff]  ;;  %v3239_v49 = vpop.f32.mrf.mxu1  ;;  %v1251_v33 = vld [vmem:[#allocation2 + $0x68] sm:$0xff] }
 0x12d   : > { %1428 = vst.msk [vmem:[#allocation2 + $0x20] sm:$0xff] %vm281_vm4, %v1412_v23  ;;  %1633 = vst.msk [vmem:[#allocation2 + $0x8] sm:$0xff] %vm281_vm4, %v1617_v20  ;;  %v1415_v30 = vadd.f32 %v3213_v26, %v1245_v22  ;;  %v1616_v51 = vadd.f32 %v1537_v35, %v1446_v39 }
 0x12e   : > { %v1359_v58 = vpop.f32.mrf.mxu0  ;;  %v1449_v59 = vld [vmem:[#allocation2 + $0x18] sm:$0xff]  ;;  %v1567_v2 = vpop.f32.mrf.mxu1  ;;  %v1250_v44 = vld [vmem:[#allocation2 + $0x60] sm:$0xff] }
 0x12f   : > { %1431 = vst.msk [vmem:[#allocation2 + $0x38] sm:$0xff] %vm281_vm4, %v1415_v30  ;;  %1632 = vst.msk [vmem:[#allocation2] sm:$0xff] %vm281_vm4, %v1616_v51  ;;  %v1414_v45 = vadd.f32 %v1359_v58, %v1244_v14  ;;  %v1619_v3 = vadd.f32 %v3233_v46, %v1449_v59 }
 0x130   : > { %v3216_v34 = vpop.f32.mrf.mxu0  ;;  %v1448_v36 = vld [vmem:[#allocation2 + $0x10] sm:$0xff]  ;;  %v3242_v10 = vpop.f32.mrf.mxu1  ;;  %v1253_v57 = vld [vmem:[#allocation2 + $0x78] sm:$0xff] }
 0x131   : > { %1430 = vst.msk [vmem:[#allocation2 + $0x30] sm:$0xff] %vm281_vm4, %v1414_v45  ;;  %1635 = vst.msk [vmem:[#allocation2 + $0x18] sm:$0xff] %vm281_vm4, %v1619_v3  ;;  %v1417_v37 = vadd.f32 %v3216_v34, %v1247_v5  ;;  %v1618_v47 = vadd.f32 %v1547_v60, %v1448_v36 }
 0x132   : > { %v1369_v32 = vpop.f32.mrf.mxu0  ;;  %v1451_v9 = vld [vmem:[#allocation2 + $0x28] sm:$0xff]  ;;  %v1577_v41 = vpop.f32.mrf.mxu1  ;;  %v1252_v29 = vld [vmem:[#allocation2 + $0x70] sm:$0xff] }
 0x133   : > { %1433 = vst.msk [vmem:[#allocation2 + $0x48] sm:$0xff] %vm281_vm4, %v1417_v37  ;;  %1634 = vst.msk [vmem:[#allocation2 + $0x10] sm:$0xff] %vm281_vm4, %v1618_v47  ;;  %v1416_v48 = vadd.f32 %v1369_v32, %v1246_v31  ;;  %v1621_v55 = vadd.f32 %v3236_v8, %v1451_v9 }
 0x134   : > { %v3219_v53 = vpop.f32.mrf.mxu0  ;;  %v1450_v7 = vld [vmem:[#allocation2 + $0x20] sm:$0xff]  ;;  %v3245_v16 = vpop.f32.mrf.mxu1 }
 0x135   : > { %1432 = vst.msk [vmem:[#allocation2 + $0x40] sm:$0xff] %vm281_vm4, %v1416_v48  ;;  %1637 = vst.msk [vmem:[#allocation2 + $0x28] sm:$0xff] %vm281_vm4, %v1621_v55  ;;  %v1419_v18 = vadd.f32 %v3219_v53, %v1249_v62  ;;  %v1620_v13 = vadd.f32 %v1557_v6, %v1450_v7  ;;  %v1690_v6 = vld [vmem:[#allocation2 + $0x8] sm:$0xff] }
 0x136   : > { %v1379_v15 = vpop.f32.mrf.mxu0  ;;  %v1453_v25 = vld [vmem:[#allocation2 + $0x38] sm:$0xff]  ;;  %v1587_v21 = vpop.f32.mrf.mxu1 }
 0x137   : > { %1435 = vst.msk [vmem:[#allocation2 + $0x58] sm:$0xff] %vm281_vm4, %v1419_v18  ;;  %1636 = vst.msk [vmem:[#allocation2 + $0x20] sm:$0xff] %vm281_vm4, %v1620_v13  ;;  %v1418_v28 = vadd.f32 %v1379_v15, %v1248_v24  ;;  %v1623_v27 = vadd.f32 %v3239_v49, %v1453_v25  ;;  %v1689_v49 = vld [vmem:[#allocation2] sm:$0xff] }
 0x138   : > { %v3222_v35 = vpop.f32.mrf.mxu0  ;;  %v1452_v38 = vld [vmem:[#allocation2 + $0x30] sm:$0xff]  ;;  %v3248_v40 = vpop.f32.mrf.mxu1 }
 0x139   : > { %1434 = vst.msk [vmem:[#allocation2 + $0x50] sm:$0xff] %vm281_vm4, %v1418_v28  ;;  %1639 = vst.msk [vmem:[#allocation2 + $0x38] sm:$0xff] %vm281_vm4, %v1623_v27  ;;  %v1421_v42 = vadd.f32 %v3222_v35, %v1251_v33  ;;  %v1622_v43 = vadd.f32 %v1567_v2, %v1452_v38  ;;  %v1692_v2 = vld [vmem:[#allocation2 + $0x18] sm:$0xff] }
 0x13a   : > { %v1389_v46 = vpop.f32.mrf.mxu0  ;;  %v1455_v50 = vld [vmem:[#allocation2 + $0x48] sm:$0xff]  ;;  %v1597_v52 = vpop.f32.mrf.mxu1 }
 0x13b   : > { %1437 = vst.msk [vmem:[#allocation2 + $0x68] sm:$0xff] %vm281_vm4, %v1421_v42  ;;  %1638 = vst.msk [vmem:[#allocation2 + $0x30] sm:$0xff] %vm281_vm4, %v1622_v43  ;;  %v1420_v54 = vadd.f32 %v1389_v46, %v1250_v44  ;;  %v1625_v56 = vadd.f32 %v3242_v10, %v1455_v50  ;;  %v1691_v10 = vld [vmem:[#allocation2 + $0x10] sm:$0xff] }
 0x13c   : > { %v3225_v60 = vpop.f32.mrf.mxu0  ;;  %v1454_v63 = vld [vmem:[#allocation2 + $0x40] sm:$0xff]  ;;  %v3251_v0 = vpop.f32.mrf.mxu1 }
 0x13d   : > { %1436 = vst.msk [vmem:[#allocation2 + $0x60] sm:$0xff] %vm281_vm4, %v1420_v54  ;;  %1641 = vst.msk [vmem:[#allocation2 + $0x48] sm:$0xff] %vm281_vm4, %v1625_v56  ;;  %v1423_v4 = vadd.f32 %v3225_v60, %v1253_v57  ;;  %v1624_v12 = vadd.f32 %v1577_v41, %v1454_v63  ;;  %v1694_v41 = vld [vmem:[#allocation2 + $0x28] sm:$0xff] }
 0x13e   : > { %v1399_v8 = vpop.f32.mrf.mxu0  ;;  %v1457_v61 = vld [vmem:[#allocation2 + $0x58] sm:$0xff]  ;;  %v1607_v1 = vpop.f32.mrf.mxu1  ;;  %v1693_v7 = vld [vmem:[#allocation2 + $0x20] sm:$0xff] }
 0x13f   : > { %1439 = vst.msk [vmem:[#allocation2 + $0x78] sm:$0xff] %vm281_vm4, %v1423_v4  ;;  %1640 = vst.msk [vmem:[#allocation2 + $0x40] sm:$0xff] %vm281_vm4, %v1624_v12  ;;  %v1422_v19 = vadd.f32 %v1399_v8, %v1252_v29  ;;  %v1627_v11 = vadd.f32 %v3245_v16, %v1457_v61 }
 0x140   : > { %v1456_v17 = vld [vmem:[#allocation2 + $0x50] sm:$0xff]  ;;  %v3256_v23 = vpop.f32.mrf.mxu0  ;;  %v3282_v20 = vpop.f32.mrf.mxu1  ;;  %v1696_v25 = vld [vmem:[#allocation2 + $0x38] sm:$0xff] }
 0x141   : > { %1438 = vst.msk [vmem:[#allocation2 + $0x70] sm:$0xff] %vm281_vm4, %v1422_v19  ;;  %1643 = vst.msk [vmem:[#allocation2 + $0x58] sm:$0xff] %vm281_vm4, %v1627_v11  ;;  %v1626_v22 = vadd.f32 %v1587_v21, %v1456_v17  ;;  %v1888_v26 = vadd.f32 %v3256_v23, %v1690_v6 }
 0x142   : > { %v1459_v39 = vld [vmem:[#allocation2 + $0x68] sm:$0xff]  ;;  %v1808_v30 = vpop.f32.mrf.mxu0  ;;  %v2015_v51 = vpop.f32.mrf.mxu1  ;;  %v1695_v38 = vld [vmem:[#allocation2 + $0x30] sm:$0xff] }
 0x143   : > { %1642 = vst.msk [vmem:[#allocation2 + $0x50] sm:$0xff] %vm281_vm4, %v1626_v22  ;;  %1904 = vst.msk [vmem:[#allocation2 + $0x8] sm:$0xff] %vm281_vm4, %v1888_v26  ;;  %v1629_v14 = vadd.f32 %v3248_v40, %v1459_v39  ;;  %v1887_v58 = vadd.f32 %v1808_v30, %v1689_v49 }
 0x144   : > { %v1458_v59 = vld [vmem:[#allocation2 + $0x60] sm:$0xff]  ;;  %v3259_v45 = vpop.f32.mrf.mxu0  ;;  %v3285_v3 = vpop.f32.mrf.mxu1  ;;  %v1698_v50 = vld [vmem:[#allocation2 + $0x48] sm:$0xff] }
 0x145   : > { %1645 = vst.msk [vmem:[#allocation2 + $0x68] sm:$0xff] %vm281_vm4, %v1629_v14  ;;  %1903 = vst.msk [vmem:[#allocation2] sm:$0xff] %vm281_vm4, %v1887_v58  ;;  %v1628_v5 = vadd.f32 %v1597_v52, %v1458_v59  ;;  %v1890_v34 = vadd.f32 %v3259_v45, %v1692_v2 }
 0x146   : > { %v1461_v36 = vld [vmem:[#allocation2 + $0x78] sm:$0xff]  ;;  %v1818_v37 = vpop.f32.mrf.mxu0  ;;  %v2025_v47 = vpop.f32.mrf.mxu1  ;;  %v1697_v63 = vld [vmem:[#allocation2 + $0x40] sm:$0xff] }
 0x147   : > { %1644 = vst.msk [vmem:[#allocation2 + $0x60] sm:$0xff] %vm281_vm4, %v1628_v5  ;;  %1906 = vst.msk [vmem:[#allocation2 + $0x18] sm:$0xff] %vm281_vm4, %v1890_v34  ;;  %v1631_v31 = vadd.f32 %v3251_v0, %v1461_v36  ;;  %v1889_v32 = vadd.f32 %v1818_v37, %v1691_v10 }
 0x148   : > { %v1460_v9 = vld [vmem:[#allocation2 + $0x70] sm:$0xff]  ;;  %v3262_v48 = vpop.f32.mrf.mxu0  ;;  %v3288_v55 = vpop.f32.mrf.mxu1  ;;  %v1700_v61 = vld [vmem:[#allocation2 + $0x58] sm:$0xff] }
 0x149   : > { %1647 = vst.msk [vmem:[#allocation2 + $0x78] sm:$0xff] %vm281_vm4, %v1631_v31  ;;  %1905 = vst.msk [vmem:[#allocation2 + $0x10] sm:$0xff] %vm281_vm4, %v1889_v32  ;;  %v1630_v62 = vadd.f32 %v1607_v1, %v1460_v9  ;;  %v1892_v53 = vadd.f32 %v3262_v48, %v1694_v41 }
 0x14a   : > { %v1828_v16 = vpop.f32.mrf.mxu0  ;;  %v1925_v18 = vld [vmem:[#allocation2 + $0x8] sm:$0xff]  ;;  %v2035_v13 = vpop.f32.mrf.mxu1  ;;  %v1699_v23 = vld [vmem:[#allocation2 + $0x50] sm:$0xff] }
 0x14b   : > { %1646 = vst.msk [vmem:[#allocation2 + $0x70] sm:$0xff] %vm281_vm4, %v1630_v62  ;;  %1908 = vst.msk [vmem:[#allocation2 + $0x28] sm:$0xff] %vm281_vm4, %v1892_v53  ;;  %v1891_v24 = vadd.f32 %v1828_v16, %v1693_v7  ;;  %v2095_v15 = vadd.f32 %v3282_v20, %v1925_v18 }
 0x14c   : > { %v3265_v21 = vpop.f32.mrf.mxu0  ;;  %v1924_v28 = vld [vmem:[#allocation2] sm:$0xff]  ;;  %v3291_v27 = vpop.f32.mrf.mxu1  ;;  %v1702_v30 = vld [vmem:[#allocation2 + $0x68] sm:$0xff] }
 0x14d   : > { %1907 = vst.msk [vmem:[#allocation2 + $0x20] sm:$0xff] %vm281_vm4, %v1891_v24  ;;  %2111 = vst.msk [vmem:[#allocation2 + $0x8] sm:$0xff] %vm281_vm4, %v2095_v15  ;;  %v1894_v33 = vadd.f32 %v3265_v21, %v1696_v25  ;;  %v2094_v35 = vadd.f32 %v2015_v51, %v1924_v28 }
 0x14e   : > { %v1838_v40 = vpop.f32.mrf.mxu0  ;;  %v1927_v42 = vld [vmem:[#allocation2 + $0x18] sm:$0xff]  ;;  %v2045_v43 = vpop.f32.mrf.mxu1  ;;  %v1701_v2 = vld [vmem:[#allocation2 + $0x60] sm:$0xff] }
 0x14f   : > { %1910 = vst.msk [vmem:[#allocation2 + $0x38] sm:$0xff] %vm281_vm4, %v1894_v33  ;;  %2110 = vst.msk [vmem:[#allocation2] sm:$0xff] %vm281_vm4, %v2094_v35  ;;  %v1893_v44 = vadd.f32 %v1838_v40, %v1695_v38  ;;  %v2097_v46 = vadd.f32 %v3285_v3, %v1927_v42 }
 0x150   : > { %v3268_v52 = vpop.f32.mrf.mxu0  ;;  %v1926_v54 = vld [vmem:[#allocation2 + $0x10] sm:$0xff]  ;;  %v3294_v56 = vpop.f32.mrf.mxu1  ;;  %v1704_v10 = vld [vmem:[#allocation2 + $0x78] sm:$0xff] }
 0x151   : > { %1909 = vst.msk [vmem:[#allocation2 + $0x30] sm:$0xff] %vm281_vm4, %v1893_v44  ;;  %2113 = vst.msk [vmem:[#allocation2 + $0x18] sm:$0xff] %vm281_vm4, %v2097_v46  ;;  %v1896_v57 = vadd.f32 %v3268_v52, %v1698_v50  ;;  %v2096_v60 = vadd.f32 %v2025_v47, %v1926_v54 }
 0x152   : > { %v1848_v0 = vpop.f32.mrf.mxu0  ;;  %v1929_v4 = vld [vmem:[#allocation2 + $0x28] sm:$0xff]  ;;  %v2055_v12 = vpop.f32.mrf.mxu1  ;;  %v1703_v9 = vld [vmem:[#allocation2 + $0x70] sm:$0xff] }
 0x153   : > { %1912 = vst.msk [vmem:[#allocation2 + $0x48] sm:$0xff] %vm281_vm4, %v1896_v57  ;;  %2112 = vst.msk [vmem:[#allocation2 + $0x10] sm:$0xff] %vm281_vm4, %v2096_v60  ;;  %v1895_v29 = vadd.f32 %v1848_v0, %v1697_v63  ;;  %v2099_v8 = vadd.f32 %v3288_v55, %v1929_v4  ;;  %v4325_v0 = vld [vmem:[%s4449_s2] ss:$0 sm:$0xff] }
 0x154   : > { %v3271_v1 = vpop.f32.mrf.mxu0  ;;  %v1928_v19 = vld [vmem:[#allocation2 + $0x20] sm:$0xff]  ;;  %v3297_v11 = vpop.f32.mrf.mxu1  ;;  %v2132_v16 = vld [vmem:[#allocation2 + $0x8] sm:$0xff] }
 0x155   : > { %1911 = vst.msk [vmem:[#allocation2 + $0x40] sm:$0xff] %vm281_vm4, %v1895_v29  ;;  %2115 = vst.msk [vmem:[#allocation2 + $0x28] sm:$0xff] %vm281_vm4, %v2099_v8  ;;  %v1898_v17 = vadd.f32 %v3271_v1, %v1700_v61  ;;  %v2098_v6 = vadd.f32 %v2035_v13, %v1928_v19  ;;  %v4334_v19 = vld [vmem:[%s4450_s3] ss:$0 sm:$0xff] }
 0x156   : > { %v1858_v20 = vpop.f32.mrf.mxu0  ;;  %v1931_v22 = vld [vmem:[#allocation2 + $0x38] sm:$0xff]  ;;  %v2065_v26 = vpop.f32.mrf.mxu1  ;;  %v2131_v25 = vld [vmem:[#allocation2] sm:$0xff] }
 0x157   : > { %1914 = vst.msk [vmem:[#allocation2 + $0x58] sm:$0xff] %vm281_vm4, %v1898_v17  ;;  %2114 = vst.msk [vmem:[#allocation2 + $0x20] sm:$0xff] %vm281_vm4, %v2098_v6  ;;  %v1897_v39 = vadd.f32 %v1858_v20, %v1699_v23  ;;  %v2101_v49 = vadd.f32 %v3291_v27, %v1931_v22 }
 0x158   : > { %v3274_v51 = vpop.f32.mrf.mxu0  ;;  %v1930_v14 = vld [vmem:[#allocation2 + $0x30] sm:$0xff]  ;;  %v3300_v5 = vpop.f32.mrf.mxu1  ;;  %v2134_v38 = vld [vmem:[#allocation2 + $0x18] sm:$0xff] }
 0x159   : > { %1913 = vst.msk [vmem:[#allocation2 + $0x50] sm:$0xff] %vm281_vm4, %v1897_v39  ;;  %2117 = vst.msk [vmem:[#allocation2 + $0x38] sm:$0xff] %vm281_vm4, %v2101_v49  ;;  %v1900_v58 = vadd.f32 %v3274_v51, %v1702_v30  ;;  %v2100_v59 = vadd.f32 %v2045_v43, %v1930_v14 }
 0x15a   : > { %v1868_v45 = vpop.f32.mrf.mxu0  ;;  %v1933_v3 = vld [vmem:[#allocation2 + $0x48] sm:$0xff]  ;;  %v2075_v55 = vpop.f32.mrf.mxu1  ;;  %v2133_v46 = vld [vmem:[#allocation2 + $0x10] sm:$0xff] }
 0x15b   : > { %1916 = vst.msk [vmem:[#allocation2 + $0x68] sm:$0xff] %vm281_vm4, %v1900_v58  ;;  %2116 = vst.msk [vmem:[#allocation2 + $0x30] sm:$0xff] %vm281_vm4, %v2100_v59  ;;  %v1899_v34 = vadd.f32 %v1868_v45, %v1701_v2  ;;  %v2103_v36 = vadd.f32 %v3294_v56, %v1933_v3 }
 0x15c   : > { %v3277_v37 = vpop.f32.mrf.mxu0  ;;  %v1932_v47 = vld [vmem:[#allocation2 + $0x40] sm:$0xff]  ;;  %v3303_v28 = vpop.f32.mrf.mxu1  ;;  %v2136_v60 = vld [vmem:[#allocation2 + $0x28] sm:$0xff] }
 0x15d   : > { %1915 = vst.msk [vmem:[#allocation2 + $0x60] sm:$0xff] %vm281_vm4, %v1899_v34  ;;  %2119 = vst.msk [vmem:[#allocation2 + $0x48] sm:$0xff] %vm281_vm4, %v2103_v36  ;;  %v1902_v31 = vadd.f32 %v3277_v37, %v1704_v10  ;;  %v2102_v32 = vadd.f32 %v2055_v12, %v1932_v47 }
 0x15e   : > { %v1878_v41 = vpop.f32.mrf.mxu0  ;;  %v1935_v48 = vld [vmem:[#allocation2 + $0x58] sm:$0xff]  ;;  %v2085_v52 = vpop.f32.mrf.mxu1  ;;  %v2135_v29 = vld [vmem:[#allocation2 + $0x20] sm:$0xff] }
 0x15f   : > { %1918 = vst.msk [vmem:[#allocation2 + $0x78] sm:$0xff] %vm281_vm4, %v1902_v31  ;;  %2118 = vst.msk [vmem:[#allocation2 + $0x40] sm:$0xff] %vm281_vm4, %v2102_v32  ;;  %v1901_v62 = vadd.f32 %v1878_v41, %v1703_v9  ;;  %v2105_v53 = vadd.f32 %v3297_v11, %v1935_v48 }
 0x160   : > { %v1934_v7 = vld [vmem:[#allocation2 + $0x50] sm:$0xff]  ;;  %v3308_v18 = vpop.f32.mrf.mxu0  ;;  %v2138_v17 = vld [vmem:[#allocation2 + $0x38] sm:$0xff] }
 0x161   : > { %1917 = vst.msk [vmem:[#allocation2 + $0x70] sm:$0xff] %vm281_vm4, %v1901_v62  ;;  %2121 = vst.msk [vmem:[#allocation2 + $0x58] sm:$0xff] %vm281_vm4, %v2105_v53  ;;  %v2104_v13 = vadd.f32 %v2065_v26, %v1934_v7  ;;  %v2302_v24 = vadd.f32 %v3308_v18, %v2132_v16 }
 0x162   : > { %v1937_v15 = vld [vmem:[#allocation2 + $0x68] sm:$0xff]  ;;  %v2222_v21 = vpop.f32.mrf.mxu0  ;;  %v2137_v26 = vld [vmem:[#allocation2 + $0x30] sm:$0xff] }
 0x163   : > { %2120 = vst.msk [vmem:[#allocation2 + $0x50] sm:$0xff] %vm281_vm4, %v2104_v13  ;;  %2318 = vst.msk [vmem:[#allocation2 + $0x8] sm:$0xff] %vm281_vm4, %v2302_v24  ;;  %v2107_v27 = vadd.f32 %v3300_v5, %v1937_v15  ;;  %v2301_v33 = vadd.f32 %v2222_v21, %v2131_v25 }
 0x164   : > { %v1936_v35 = vld [vmem:[#allocation2 + $0x60] sm:$0xff]  ;;  %v3311_v40 = vpop.f32.mrf.mxu0  ;;  %v2140_v59 = vld [vmem:[#allocation2 + $0x48] sm:$0xff] }
 0x165   : > { %2123 = vst.msk [vmem:[#allocation2 + $0x68] sm:$0xff] %vm281_vm4, %v2107_v27  ;;  %2317 = vst.msk [vmem:[#allocation2] sm:$0xff] %vm281_vm4, %v2301_v33  ;;  %v2106_v42 = vadd.f32 %v2075_v55, %v1936_v35  ;;  %v2304_v43 = vadd.f32 %v3311_v40, %v2134_v38 }
 0x166   : > { %v1939_v44 = vld [vmem:[#allocation2 + $0x78] sm:$0xff]  ;;  %v2232_v50 = vpop.f32.mrf.mxu0  ;;  %v2139_v36 = vld [vmem:[#allocation2 + $0x40] sm:$0xff] }
 0x167   : > { %2122 = vst.msk [vmem:[#allocation2 + $0x60] sm:$0xff] %vm281_vm4, %v2106_v42  ;;  %2320 = vst.msk [vmem:[#allocation2 + $0x18] sm:$0xff] %vm281_vm4, %v2304_v43  ;;  %v2109_v54 = vadd.f32 %v3303_v28, %v1939_v44  ;;  %v2303_v56 = vadd.f32 %v2232_v50, %v2133_v46 }
 0x168   : > { %v1938_v57 = vld [vmem:[#allocation2 + $0x70] sm:$0xff]  ;;  %v3314_v63 = vpop.f32.mrf.mxu0  ;;  %v2142_v48 = vld [vmem:[#allocation2 + $0x58] sm:$0xff] }
 0x169   : > { %2125 = vst.msk [vmem:[#allocation2 + $0x78] sm:$0xff] %vm281_vm4, %v2109_v54  ;;  %2319 = vst.msk [vmem:[#allocation2 + $0x10] sm:$0xff] %vm281_vm4, %v2303_v56  ;;  %v2108_v4 = vadd.f32 %v2085_v52, %v1938_v57  ;;  %v2306_v12 = vadd.f32 %v3314_v63, %v2136_v60 }
 0x16a   : > { %v2242_v8 = vpop.f32.mrf.mxu0  ;;  %v2334_v61 = vld [vmem:[#allocation2 + $0x8] sm:$0xff]  ;;  %v2141_v18 = vld [vmem:[#allocation2 + $0x50] sm:$0xff] }
 0x16b   : > { %2124 = vst.msk [vmem:[#allocation2 + $0x70] sm:$0xff] %vm281_vm4, %v2108_v4  ;;  %2322 = vst.msk [vmem:[#allocation2 + $0x28] sm:$0xff] %vm281_vm4, %v2306_v12  ;;  %v2305_v1 = vadd.f32 %v2242_v8, %v2135_v29  ;;  %v2357_v11 = vmul.f32 %v4325_v0, %v2334_v61 }
 0x16c   : > { %v3317_v6 = vpop.f32.mrf.mxu0  ;;  %v2333_v23 = vld [vmem:[#allocation2] sm:$0xff]  ;;  %v2144_v33 = vld [vmem:[#allocation2 + $0x68] sm:$0xff] }
 0x16d   : > { %2321 = vst.msk [vmem:[#allocation2 + $0x20] sm:$0xff] %vm281_vm4, %v2305_v1  ;;  %v2308_v20 = vadd.f32 %v3317_v6, %v2138_v17  ;;  %v2356_v22 = vmul.f32 %v4325_v0, %v2333_v23  ;;  %v2380_v49 = vadd.f32 %v4334_v19, %v2357_v11 }
 0x16e   : > { %v2252_v39 = vpop.f32.mrf.mxu0  ;;  %v2336_v30 = vld [vmem:[#allocation2 + $0x18] sm:$0xff]  ;;  %v2143_v44 = vld [vmem:[#allocation2 + $0x60] sm:$0xff] }
 0x16f   : > { %2324 = vst.msk [vmem:[#allocation2 + $0x38] sm:$0xff] %vm281_vm4, %v2308_v20  ;;  %v2307_v51 = vadd.f32 %v2252_v39, %v2137_v26  ;;  %v2379_v14 = vadd.f32 %v4334_v19, %v2356_v22  ;;  %v2359_v58 = vmul.f32 %v4325_v0, %v2336_v30  ;;  %v2396_v37 = vmax.f32 %v2380_v49, 0.0 }
 0x170   : > { %v3320_v2 = vpop.f32.mrf.mxu0  ;;  %v2335_v45 = vld [vmem:[#allocation2 + $0x10] sm:$0xff]  ;;  %v2146_v63 = vld [vmem:[#allocation2 + $0x78] sm:$0xff] }
 0x171   : > { %2323 = vst.msk [vmem:[#allocation2 + $0x30] sm:$0xff] %vm281_vm4, %v2307_v51  ;;  %v2310_v3 = vadd.f32 %v3320_v2, %v2140_v59  ;;  %v2395_v5 = vmax.f32 %v2379_v14, 0.0  ;;  %v2358_v34 = vmul.f32 %v4325_v0, %v2335_v45  ;;  %v2382_v47 = vadd.f32 %v4334_v19, %v2359_v58 }
 0x172   : > { %v2262_v10 = vpop.f32.mrf.mxu0  ;;  %v2338_v31 = vld [vmem:[#allocation2 + $0x28] sm:$0xff]  ;;  %v2145_v1 = vld [vmem:[#allocation2 + $0x70] sm:$0xff] }
 0x173   : > { %2326 = vst.msk [vmem:[#allocation2 + $0x48] sm:$0xff] %vm281_vm4, %v2310_v3  ;;  %v2309_v32 = vadd.f32 %v2262_v10, %v2139_v36  ;;  %3332 = vmatprep.mubr.msk.f32.mxu1 %vm281_vm4, %v2395_v5  ;;  %v2381_v9 = vadd.f32 %v4334_v19, %v2358_v34  ;;  %v2361_v41 = vmul.f32 %v4325_v0, %v2338_v31  ;;  %v2398_v24 = vmax.f32 %v2382_v47, 0.0 }
 0x174   : > { %v3323_v55 = vpop.f32.mrf.mxu0  ;;  %3333 = vmatmul.mubr.msk.f32.vlgmr.msra.gmra.mxu1 %vm281_vm4, %v2396_v37  ;;  %v2337_v62 = vld [vmem:[#allocation2 + $0x20] sm:$0xff] }
 0x175   : > { %2325 = vst.msk [vmem:[#allocation2 + $0x40] sm:$0xff] %vm281_vm4, %v2309_v32  ;;  %v2312_v53 = vadd.f32 %v3323_v55, %v2142_v48  ;;  %v2397_v7 = vmax.f32 %v2381_v9, 0.0  ;;  %v2360_v16 = vmul.f32 %v4325_v0, %v2337_v62  ;;  %v2384_v15 = vadd.f32 %v4334_v19, %v2361_v41 }
 0x176   : > { %v2272_v13 = vpop.f32.mrf.mxu0  ;;  %v2340_v25 = vld [vmem:[#allocation2 + $0x38] sm:$0xff] }
 0x177   : > { %2328 = vst.msk [vmem:[#allocation2 + $0x58] sm:$0xff] %vm281_vm4, %v2312_v53  ;;  %v2311_v21 = vadd.f32 %v2272_v13, %v2141_v18  ;;  %3335 = vmatprep.mubr.msk.f32.mxu1 %vm281_vm4, %v2397_v7  ;;  %v2383_v28 = vadd.f32 %v4334_v19, %v2360_v16  ;;  %v2363_v27 = vmul.f32 %v4325_v0, %v2340_v25  ;;  %v2400_v50 = vmax.f32 %v2384_v15, 0.0 }
 0x178   : > { %v3326_v35 = vpop.f32.mrf.mxu0  ;;  %3336 = vmatmul.mubr.msk.f32.gmra.mxu1 %vm281_vm4, %v2398_v24  ;;  %v2339_v38 = vld [vmem:[#allocation2 + $0x30] sm:$0xff] }
 0x179   : > { %2327 = vst.msk [vmem:[#allocation2 + $0x50] sm:$0xff] %vm281_vm4, %v2311_v21  ;;  %v2314_v40 = vadd.f32 %v3326_v35, %v2144_v33  ;;  %v2399_v42 = vmax.f32 %v2383_v28, 0.0  ;;  %v2362_v43 = vmul.f32 %v4325_v0, %v2339_v38  ;;  %v2386_v52 = vadd.f32 %v4334_v19, %v2363_v27 }
 0x17a   : > { %v2282_v46 = vpop.f32.mrf.mxu0  ;;  %v2342_v54 = vld [vmem:[#allocation2 + $0x48] sm:$0xff] }
 0x17b   : > { %2330 = vst.msk [vmem:[#allocation2 + $0x68] sm:$0xff] %vm281_vm4, %v2314_v40  ;;  %v2313_v56 = vadd.f32 %v2282_v46, %v2143_v44  ;;  %3338 = vmatprep.mubr.msk.f32.mxu1 %vm281_vm4, %v2399_v42  ;;  %v2385_v57 = vadd.f32 %v4334_v19, %v2362_v43  ;;  %v2365_v60 = vmul.f32 %v4325_v0, %v2342_v54  ;;  %v2402_v17 = vmax.f32 %v2386_v52, 0.0 }
 0x17c   : > { %v3329_v4 = vpop.f32.mrf.mxu0  ;;  %3339 = vmatmul.mubr.msk.f32.gmra.mxu1 %vm281_vm4, %v2400_v50  ;;  %v2341_v12 = vld [vmem:[#allocation2 + $0x40] sm:$0xff] }
 0x17d   : > { %2329 = vst.msk [vmem:[#allocation2 + $0x60] sm:$0xff] %vm281_vm4, %v2313_v56  ;;  %v2316_v29 = vadd.f32 %v3329_v4, %v2146_v63  ;;  %v2401_v8 = vmax.f32 %v2385_v57, 0.0  ;;  %v2364_v61 = vmul.f32 %v4325_v0, %v2341_v12  ;;  %v2388_v6 = vadd.f32 %v4334_v19, %v2365_v60 }
 0x17e   : > { %v2292_v11 = vpop.f32.mrf.mxu0  ;;  %v2344_v23 = vld [vmem:[#allocation2 + $0x58] sm:$0xff] }
 0x17f   : > { %2332 = vst.msk [vmem:[#allocation2 + $0x78] sm:$0xff] %vm281_vm4, %v2316_v29  ;;  %v2315_v20 = vadd.f32 %v2292_v11, %v2145_v1  ;;  %3341 = vmatprep.mubr.msk.f32.mxu1 %vm281_vm4, %v2401_v8  ;;  %v2387_v22 = vadd.f32 %v4334_v19, %v2364_v61  ;;  %v2367_v26 = vmul.f32 %v4325_v0, %v2344_v23  ;;  %v2404_v51 = vmax.f32 %v2388_v6, 0.0 }
 0x180   : > { %3342 = vmatmul.mubr.msk.f32.gmra.mxu1 %vm281_vm4, %v2402_v17  ;;  %v2343_v39 = vld [vmem:[#allocation2 + $0x50] sm:$0xff] }
 0x181   : > { %2331 = vst.msk [vmem:[#allocation2 + $0x70] sm:$0xff] %vm281_vm4, %v2315_v20  ;;  %v2403_v49 = vmax.f32 %v2387_v22, 0.0  ;;  %v2366_v30 = vmul.f32 %v4325_v0, %v2343_v39  ;;  %v2390_v14 = vadd.f32 %v4334_v19, %v2367_v26 }
 0x182   : > { %v2346_v58 = vld [vmem:[#allocation2 + $0x68] sm:$0xff] }
 0x183   : > { %3344 = vmatprep.mubr.msk.f32.mxu1 %vm281_vm4, %v2403_v49  ;;  %v2389_v59 = vadd.f32 %v4334_v19, %v2366_v30  ;;  %v2369_v2 = vmul.f32 %v4325_v0, %v2346_v58  ;;  %v2406_v34 = vmax.f32 %v2390_v14, 0.0 }
 0x184   : > { %3345 = vmatmul.mubr.msk.f32.gmra.mxu1 %vm281_vm4, %v2404_v51  ;;  %v2345_v45 = vld [vmem:[#allocation2 + $0x60] sm:$0xff] }
 0x185   : > { %v2405_v3 = vmax.f32 %v2389_v59, 0.0  ;;  %v2368_v5 = vmul.f32 %v4325_v0, %v2345_v45  ;;  %v2392_v36 = vadd.f32 %v4334_v19, %v2369_v2 }
 0x186   : > { %v2348_v10 = vld [vmem:[#allocation2 + $0x78] sm:$0xff] }
 0x187   : > { %3347 = vmatprep.mubr.msk.f32.mxu1 %vm281_vm4, %v2405_v3  ;;  %v2391_v37 = vadd.f32 %v4334_v19, %v2368_v5  ;;  %v2371_v47 = vmul.f32 %v4325_v0, %v2348_v10  ;;  %v2408_v41 = vmax.f32 %v2392_v36, 0.0 }
 0x188   : > { %3348 = vmatmul.mubr.msk.f32.gmra.mxu1 %vm281_vm4, %v2406_v34  ;;  %v2347_v31 = vld [vmem:[#allocation2 + $0x70] sm:$0xff] }
 0x189   : > { %v2407_v32 = vmax.f32 %v2391_v37, 0.0  ;;  %v2370_v9 = vmul.f32 %v4325_v0, %v2347_v31  ;;  %v2394_v48 = vadd.f32 %v4334_v19, %v2371_v47 }
 0x18b   : > { %3350 = vmatprep.mubr.msk.f32.mxu1 %vm281_vm4, %v2407_v32  ;;  %v2393_v55 = vadd.f32 %v4334_v19, %v2370_v9  ;;  %v2410_v53 = vmax.f32 %v2394_v48, 0.0 }
 0x18c   : > { %3351 = vmatmul.mubr.msk.f32.gmra.mxu1 %vm281_vm4, %v2408_v41 }
 0x18d   : > { %v2409_v62 = vmax.f32 %v2393_v55, 0.0 }
 0x18f   : > { %3353 = vmatprep.mubr.msk.f32.mxu1 %vm281_vm4, %v2409_v62 }
 0x190   : > { %3354 = vmatmul.mubr.msk.f32.gmra.mxu1 %vm281_vm4, %v2410_v53 }
 0x234   : > { %v3334_v7 = vpop.f32.mrf.mxu1 }
 0x236   : > { %v2526_v16 = vpop.f32.mrf.mxu1 }
 0x237   : > { %2605 = vxpose.xlu0.b32.start [1/16] (narrow) %v2526_v16, 8 }
 0x238   : > { %v3337_v18 = vpop.f32.mrf.mxu1 }
 0x23a   : > { %v2536_v0 = vpop.f32.mrf.mxu1 }
 0x23b   : > { %2606 = vxpose.xlu0.b32.cont [2/16] (narrow) %v3334_v7, 8 }
 0x23c   : > { %v3340_v13 = vpop.f32.mrf.mxu1 }
 0x23e   : > { %v2546_v24 = vpop.f32.mrf.mxu1 }
 0x23f   : > { %2607 = vxpose.xlu0.b32.cont [3/16] (narrow) %v2536_v0, 8 }
 0x240   : > { %v3343_v19 = vpop.f32.mrf.mxu1 }
 0x242   : > { %v2556_v15 = vpop.f32.mrf.mxu1 }
 0x243   : > { %2608 = vxpose.xlu0.b32.cont [4/16] (narrow) %v3337_v18, 8 }
 0x244   : > { %v3346_v25 = vpop.f32.mrf.mxu1 }
 0x246   : > { %v2566_v21 = vpop.f32.mrf.mxu1 }
 0x247   : > { %2609 = vxpose.xlu0.b32.cont [5/16] (narrow) %v2546_v24, 8 }
 0x248   : > { %v3349_v28 = vpop.f32.mrf.mxu1 }
 0x24a   : > { %v2576_v27 = vpop.f32.mrf.mxu1 }
 0x24b   : > { %2610 = vxpose.xlu0.b32.cont [6/16] (narrow) %v3340_v13, 8 }
 0x24c   : > { %v3352_v33 = vpop.f32.mrf.mxu1 }
 0x24e   : > { %v2586_v35 = vpop.f32.mrf.mxu1 }
 0x24f   : > { %2611 = vxpose.xlu0.b32.cont [7/16] (narrow) %v2556_v15, 8 }
 0x250   : > { %v3355_v38 = vpop.f32.mrf.mxu1 }
 0x252   : > { %v2596_v40 = vpop.f32.mrf.mxu1 }
 0x253   : > { %2612 = vxpose.xlu0.b32.cont [8/16] (narrow) %v3343_v19, 8 }
 0x257   : > { %2613 = vxpose.xlu0.b32.cont [9/16] (narrow) %v2566_v21, 8 }
 0x25b   : > { %2614 = vxpose.xlu0.b32.cont [10/16] (narrow) %v3346_v25, 8 }
 0x25f   : > { %2615 = vxpose.xlu0.b32.cont [11/16] (narrow) %v2576_v27, 8 }
 0x263   : > { %2616 = vxpose.xlu0.b32.cont [12/16] (narrow) %v3349_v28, 8 }
 0x267   : > { %2617 = vxpose.xlu0.b32.cont [13/16] (narrow) %v2586_v35, 8 }
 0x26b   : > { %2618 = vxpose.xlu0.b32.cont [14/16] (narrow) %v3352_v33, 8 }
 0x26f   : > { %2619 = vxpose.xlu0.b32.cont [15/16] (narrow) %v2596_v40, 8 }
 0x273   : > { %2620 = vxpose.xlu0.b32.end [16/16] (narrow) %v3355_v38, 8 }
 0x2b3   : > { %v2621_v42 = vpop.trf.xlu0 }
 0x2b4   : > { %2637 = vst [vmem:[%s241_s13] sm:$0xf] %v2621_v42 }
 0x2b5   : > { %3443 = shalt.err (!%p3440_p7)
}
 0x2b6   : > { %s3444_s10 = scalar_lea.hbm %s2652_s26, 64  ;;  %s3448_s13 = scalar_lea.hbm %s4452_s5, 256 }
 0x2b7   : > { %p3445_p9 = scmp.ne.s32.totalorder %s2652_s26, %s3444_s10  ;;  %p3449_p12 = scmp.lt.s32.totalorder %s2652_s26, %s4452_s5 }
 0x2b8   : > { %p3450_p13 = scmp.lt.s32.totalorder %s3448_s13, %s3444_s10 }
 0x2b9   : > { %p3446_p10 = pnand %p3445_p9, %p3607_p3 }
 0x2ba   : > { %p3451_p0 = por %p3450_p13, %p3449_p12 }
 0x2bb   : > { %p3447_p11 = pneg %p3446_p10 }
 0x2bd   : > { %p3452_p1 = pnand %p3451_p0, %p3447_p11 }
 0x2bf   : > { %3455 = shalt.err (!%p3452_p1)
}
 0x2c0   : > { %3358 = dma.vmem_to_hbm [thread:$0]  (%p3607_p3), %s4398_s14, 64, %s2652_s26, %s2639_s27  }
 0x2c1 PF: > { %p3364_p2 = scmp.ge.s32.totalorder %s3522_s25, 2  ;;  %s2666_s17 = sand.u32 1, %s3494_s18  }
 0x2c2   : > { %s2667_s30 = scalar_lea.sflag [#allocation4], %s2666_s17 }
 0x2c3   : > { %p3361_p4 = pnand %p3364_p2, %p3616_p8 }
 0x2c5   : > { %p3362_p5 = pneg %p3361_p4 }
 0x2c7   : > { %3489 = dma.done.wait (%p3362_p5), %s2667_s30, 64  }
 0x2c8   : > { %3491 = vsyncadd (%p3362_p5), %s2667_s30, 4294967232  ;;  %s18_s25 = sadd.s32 1, %s3522_s25   ;;  %s4455_s18 = smov %s3498_s19 }
 0x2c9   : > { %p15_p6 = scmp.ge.s32.totalorder %s18_s25, 6   ;;  %s4456_s19 = smov %s3502_s20 }
 0x2ca   : > { %s4457_s20 = smov %s3625_s11  ;;  %s4458_s21 = smov %s3514_s23 }
 0x2cb   : > { %s4459_s22 = smov %s3518_s24  ;;  %s4460_s23 = smov %s4463_s28 }
 0x2cc   : > { %s4461_s24 = smov %s4467_s29  ;;  %17 = sbr.rel (!%p15_p6) target bundleno = 5 (0x5), region = 83 }
 0x2d1   :  { %2672 = vsyncpa [#allocation4], 1 }
 0x2d2   :  { %2674 = vsyncpa [#allocation4 + $0x1], 1 }

</bundles_post_ra>
